<compile_context>
chip_gen: v7x
topology: tpu7x:2x2x1
jax: 0.10.0
libtpu: 0.0.40
codegen_flags: <defaults>
</compile_context>

<pallas_src>
import functools
from math import sqrt

import jax
import jax.numpy as jnp
from jax.experimental import pallas as pl
from jax.experimental.pallas import tpu as pltpu


def _vmem_limit_bytes():
    """~48 MiB on v7x (64 MiB physical), 64 MiB on v5e/v6e (128 MiB physical)."""
    try:
        cap = pltpu.get_tpu_info().vmem_capacity_bytes
        return int(min(cap * 3 // 4, 64 * 1024 * 1024))
    except Exception:
        return 48 * 1024 * 1024  # conservative default, safe on every generation


_VMEM_LIMIT = _vmem_limit_bytes()


# -----------------------------------------------------------------------------
# in-kernel helpers (all f32 math)
# -----------------------------------------------------------------------------
def _layernorm(x, gamma, beta, eps):
    mu = jnp.mean(x, axis=-1, keepdims=True)
    var = jnp.mean((x - mu) ** 2, axis=-1, keepdims=True)
    return (x - mu) * jax.lax.rsqrt(var + eps) * gamma + beta


def _softmax_last(a):
    a = a - jnp.max(a, axis=-1, keepdims=True)
    e = jnp.exp(a)
    # reciprocal on the EUP slot instead of a VPU divide
    return e * pl.reciprocal(jnp.sum(e, axis=-1, keepdims=True), approx=True)


def _gelu_exact(x):
    # nn.GELU() default ('none') -> exact erf formulation
    return 0.5 * x * (1.0 + jax.lax.erf(x * 0.7071067811865476))


def _pick_tile(dim, candidates):
    for c in candidates:
        if c <= dim and dim % c == 0:
            return c
    return dim  # full extent (always legal as a block dim)


def _const_spec(shape):
    """BlockSpec for a block whose index never changes across the (2-D) grid.

    Single-buffered (pl.Buffered(1)) to halve its VMEM residency; falls back to
    a plain spec if this jax version does not expose pipeline_mode/Buffered.
    """
    n = len(shape)
    idx = lambda m, i, _n=n: (0,) * _n
    try:
        return pl.BlockSpec(shape, idx, pipeline_mode=pl.Buffered(1))
    except Exception:
        return pl.BlockSpec(shape, idx)


# -----------------------------------------------------------------------------
# kernels
# -----------------------------------------------------------------------------
def attention_kernel(*refs, num_heads, head_dim, tq, input_ln_eps):
    """LN1 + multi-head self-attention + residual for one (batch, query-block).

    K/V (over the full sequence) are projected only when qi == 0 and reused from
    bf16 VMEM scratch for every query tile of the same batch row.
    """
    if input_ln_eps is not None:
        (xf_ref, in_g, in_b, ln1_g, ln1_b,
         wq, bq, wk, bk, wv, bv, wo, bo,
         out_ref, k_scr, v_scr, ctx_scr) = refs
    else:
        (xf_ref, ln1_g, ln1_b,
         wq, bq, wk, bk, wv, bv, wo, bo,
         out_ref, k_scr, v_scr, ctx_scr) = refs
        in_g = in_b = None

    qi = pl.program_id(1)

    # --- K/V projection over the full sequence, once per batch row ------------
    @pl.when(qi == 0)
    def _():
        xf = xf_ref[...].astype(jnp.float32)                       # [S, H]
        if input_ln_eps is not None:
            xf = _layernorm(xf, in_g[...], in_b[...], input_ln_eps)  # fused emb LN
        hf = _layernorm(xf, ln1_g[...], ln1_b[...], 1e-5).astype(jnp.bfloat16)
        k = jnp.dot(hf, wk[...], preferred_element_type=jnp.float32) + bk[...]
        v = jnp.dot(hf, wv[...], preferred_element_type=jnp.float32) + bv[...]
        k_scr[...] = k.astype(jnp.bfloat16)
        v_scr[...] = v.astype(jnp.bfloat16)

    # --- query rows for this tile, sliced from the resident full-seq block ----
    row0 = pl.multiple_of(qi * tq, tq)
    xq = xf_ref[pl.ds(row0, tq), :].astype(jnp.float32)            # [tq, H]
    if input_ln_eps is not None:
        xq = _layernorm(xq, in_g[...], in_b[...], input_ln_eps)    # fused emb LN
    hq = _layernorm(xq, ln1_g[...], ln1_b[...], 1e-5).astype(jnp.bfloat16)
    q = jnp.dot(hq, wq[...], preferred_element_type=jnp.float32) + bq[...]
    q = q * (1.0 / sqrt(head_dim))                                 # scale folded once

    k = k_scr[...]
    v = v_scr[...]
    # TODO(synk): for head_dim < 128 a head-major [nh, S, hd] layout would avoid
    # sub-128 lane slices here; kept flat [S, H] to minimize VMEM lane padding.
    for h in range(num_heads):               # static slices of the fused q/k/v
        lo = h * head_dim
        qh = q[:, lo:lo + head_dim].astype(jnp.bfloat16)
        kh = k[:, lo:lo + head_dim]
        vh = v[:, lo:lo + head_dim]
        # contract last dims of q/k (transpose folded into the MXU operand feed)
        s = jax.lax.dot_general(qh, kh, (((1,), (1,)), ((), ())),
                                preferred_element_type=jnp.float32)
        p = _softmax_last(s)
        ctx_scr[:, lo:lo + head_dim] = jnp.dot(
            p.astype(jnp.bfloat16), vh,
            preferred_element_type=jnp.float32).astype(jnp.bfloat16)

    # single output projection on the concatenated heads
    attn = jnp.dot(ctx_scr[...], wo[...],
                   preferred_element_type=jnp.float32) + bo[...]
    out_ref[...] = (xq + attn).astype(out_ref.dtype)


def ffn_kernel(x_ref, ln2_g, ln2_b, w1_ref, b1_ref, w2_ref, b2_ref,
               out_ref, hs_scratch, acc_scratch):
    """LN2 + FFN(GELU) + residual; grid = (row blocks, intermediate blocks)."""
    i = pl.program_id(1)

    @pl.when(i == 0)
    def _():
        x = x_ref[...].astype(jnp.float32)
        hs_scratch[...] = _layernorm(x, ln2_g[...], ln2_b[...], 1e-5).astype(jnp.bfloat16)
        acc_scratch[...] = jnp.zeros_like(acc_scratch)

    hs = hs_scratch[...]                               # already bf16 (matmul dtype)
    h1 = jnp.dot(hs, w1_ref[...], preferred_element_type=jnp.float32) + b1_ref[...]
    h1 = _gelu_exact(h1)
    acc_scratch[...] += jnp.dot(h1.astype(jnp.bfloat16), w2_ref[...],
                                preferred_element_type=jnp.float32)

    @pl.when(i == pl.num_programs(1) - 1)
    def _():
        x = x_ref[...].astype(jnp.float32)
        out_ref[...] = (x + acc_scratch[...] + b2_ref[...]).astype(out_ref.dtype)


def embed_ln_kernel(emb_ref, gamma_ref, beta_ref, out_ref):
    """Standalone embedding LayerNorm (only used if there are zero layers)."""
    x = emb_ref[0].astype(jnp.float32)
    out_ref[0] = _layernorm(x, gamma_ref[...], beta_ref[...], 1e-12).astype(out_ref.dtype)


# -----------------------------------------------------------------------------
# wrappers
# -----------------------------------------------------------------------------
def run_attention(x, layer, num_heads, head_dim, emb_ln=None):
    B, S, H = x.shape
    x = x.astype(jnp.bfloat16)
    tq = _pick_tile(S, (512, 256, 128))
    n_q = S // tq

    weights = []
    if emb_ln is not None:
        weights += [emb_ln[0], emb_ln[1]]
    weights += [layer["ln1_g"], layer["ln1_b"],
                layer["wq"], layer["bq"], layer["wk"], layer["bk"],
                layer["wv"], layer["bv"], layer["wo"], layer["bo"]]

    kernel = functools.partial(
        attention_kernel, num_heads=num_heads, head_dim=head_dim, tq=tq,
        input_ln_eps=(1e-12 if emb_ln is not None else None))

    # TODO(synk): for very long S on v7x (64 MiB VMEM) the (S,H) block + K/V scratch
    # should be replaced by a KV-block grid axis with online softmax (flash-style).
    in_specs = [pl.BlockSpec((None, S, H), lambda b, qi: (b, 0, 0))]   # full seq (bf16)
    in_specs += [_const_spec(w.shape) for w in weights]                # single-buffered

    return pl.pallas_call(
        kernel,
        out_shape=jax.ShapeDtypeStruct((B, S, H), jnp.bfloat16),
        grid=(B, n_q),
        in_specs=in_specs,
        out_specs=pl.BlockSpec((None, tq, H), lambda b, qi: (b, qi, 0)),
        scratch_shapes=[pltpu.VMEM((S, H), jnp.bfloat16),    # K (post-projection)
                        pltpu.VMEM((S, H), jnp.bfloat16),    # V (post-projection)
                        pltpu.VMEM((tq, H), jnp.bfloat16)],  # concatenated heads
        compiler_params=pltpu.CompilerParams(
            dimension_semantics=("parallel", "arbitrary"),
            vmem_limit_bytes=_VMEM_LIMIT),
    )(x, *weights)


def run_ffn(x, layer):
    B, S, H = x.shape
    M = B * S
    I = layer["w1"].shape[1]
    x2 = x.reshape(M, H).astype(jnp.bfloat16)
    tm = _pick_tile(M, (512, 256, 128, 8))

    # keep the FFN weights fully resident when small enough (fetched once per call);
    # otherwise stream them along a reduction axis into the f32 accumulator.
    if 2 * H * I * 2 <= 16 * 1024 * 1024:
        ti = I
    else:
        ti = _pick_tile(I, (2048, 1024, 512, 256))
    n_i = I // ti

    if n_i == 1:
        w1_spec = _const_spec(layer["w1"].shape)
        b1_spec = _const_spec(layer["b1"].shape)
        w2_spec = _const_spec(layer["w2"].shape)
    else:
        w1_spec = pl.BlockSpec((H, ti), lambda m, i: (0, i))
        b1_spec = pl.BlockSpec((1, ti), lambda m, i: (0, i))
        w2_spec = pl.BlockSpec((ti, H), lambda m, i: (i, 0))

    out = pl.pallas_call(
        ffn_kernel,
        out_shape=jax.ShapeDtypeStruct((M, H), jnp.bfloat16),
        grid=(M // tm, n_i),
        in_specs=[pl.BlockSpec((tm, H), lambda m, i: (m, 0)),
                  _const_spec(layer["ln2_g"].shape),
                  _const_spec(layer["ln2_b"].shape),
                  w1_spec, b1_spec, w2_spec,
                  _const_spec(layer["b2"].shape)],
        out_specs=pl.BlockSpec((tm, H), lambda m, i: (m, 0)),
        scratch_shapes=[pltpu.VMEM((tm, H), jnp.bfloat16),   # cached LN2(x), matmul dtype
                        pltpu.VMEM((tm, H), jnp.float32)],   # f32 accumulator
        compiler_params=pltpu.CompilerParams(
            dimension_semantics=("parallel", "arbitrary"),
            vmem_limit_bytes=_VMEM_LIMIT),
    )(x2, layer["ln2_g"], layer["ln2_b"],
      layer["w1"], layer["b1"], layer["w2"], layer["b2"])
    return out.reshape(B, S, H)


def run_embedding_ln(emb, gamma, beta):
    B, S, H = emb.shape
    return pl.pallas_call(
        embed_ln_kernel,
        out_shape=jax.ShapeDtypeStruct((B, S, H), jnp.float32),
        grid=(B,),
        in_specs=[pl.BlockSpec((1, S, H), lambda b: (b, 0, 0)),
                  pl.BlockSpec((1, H), lambda b: (0, 0)),
                  pl.BlockSpec((1, H), lambda b: (0, 0))],
        out_specs=pl.BlockSpec((1, S, H), lambda b: (b, 0, 0)),
        compiler_params=pltpu.CompilerParams(dimension_semantics=("parallel",)),
    )(emb, gamma, beta)


def transformer_encoder(input_ids, params, cfg):
    """Full forward pass: Embedding -> N x TransformerEncoderLayer."""
    B, S = input_ids.shape
    H = cfg["hidden_size"]
    nh = cfg["num_attention_heads"]
    hd = H // nh

    # Embedding gather (token + position) is plain-JAX glue.
    tok = jnp.take(params["token_emb"], input_ids, axis=0)        # [B, S, H]
    pos = jnp.take(params["pos_emb"], jnp.arange(S), axis=0)      # [S, H]
    emb = (tok + pos[None, :, :]).astype(jnp.bfloat16)            # bf16 activations
    # TODO(synk): nn.Dropout() after the embedding LayerNorm is identity in eval mode.

    if not params["layers"]:
        # degenerate case: no encoder layers -> just the embedding LayerNorm
        return run_embedding_ln(emb, params["emb_ln_g"], params["emb_ln_b"])

    x = emb
    for idx, layer in enumerate(params["layers"]):
        # embedding LayerNorm (eps=1e-12) is fused into the first attention call
        emb_ln = (params["emb_ln_g"], params["emb_ln_b"]) if idx == 0 else None
        x = run_attention(x, layer, nh, hd, emb_ln=emb_ln)
        x = run_ffn(x, layer)
    return x.astype(jnp.float32)


# -----------------------------------------------------------------------------
# deterministic parameter init (synthetic, shapes follow the module's __init__;
# per-head q/k/v weights stored fused as [H, H] with heads concatenated on the
# output dim, matmul weights in bf16, biases / LN params lane-dense f32)
# -----------------------------------------------------------------------------
def init_params(key, cfg):
    H = cfg["hidden_size"]
    I = cfg["intermediate_size"]
    keys = iter(jax.random.split(key, 4 + cfg["num_hidden_layers"] * 16))

    def normal(shape, dtype=jnp.bfloat16, scale=0.02):
        return (scale * jax.random.normal(next(keys), shape, jnp.float32)).astype(dtype)

    params = {
        "token_emb": normal((cfg["vocab_size"], H), jnp.float32),
        "pos_emb": normal((cfg["max_position_embeddings"], H), jnp.float32),
        "emb_ln_g": jnp.ones((1, H), jnp.float32),
        "emb_ln_b": jnp.zeros((1, H), jnp.float32),
        "layers": [],
    }
    for _ in range(cfg["num_hidden_layers"]):
        params["layers"].append({
            "ln1_g": jnp.ones((1, H), jnp.float32),
            "ln1_b": jnp.zeros((1, H), jnp.float32),
            "wq": normal((H, H)), "bq": normal((1, H), jnp.float32),
            "wk": normal((H, H)), "bk": normal((1, H), jnp.float32),
            "wv": normal((H, H)), "bv": normal((1, H), jnp.float32),
            "wo": normal((H, H)), "bo": jnp.zeros((1, H), jnp.float32),
            "ln2_g": jnp.ones((1, H), jnp.float32),
            "ln2_b": jnp.zeros((1, H), jnp.float32),
            "w1": normal((H, I)), "b1": jnp.zeros((1, I), jnp.float32),
            "w2": normal((I, H)), "b2": jnp.zeros((1, H), jnp.float32),
        })
    return params


# -----------------------------------------------------------------------------
# main
# -----------------------------------------------------------------------------
if __name__ == "__main__":
    # Small synthetic "config" (BERT structure, tiny sizes).
    cfg = dict(
        vocab_size=50,
        hidden_size=32,
        num_attention_heads=4,
        intermediate_size=64,
        num_hidden_layers=2,
        max_position_embeddings=16,
    )
    B, S = 2, 8

    root = jax.random.PRNGKey(0)
    k_param, k_ids = jax.random.split(root)
    params = init_params(k_param, cfg)
    input_ids = jax.random.randint(k_ids, (B, S), 0, cfg["vocab_size"], dtype=jnp.int32)

    out = transformer_encoder(input_ids, params, cfg)
    out = jax.block_until_ready(out)
    assert out.shape == (B, S, cfg["hidden_size"])
    assert jnp.all(jnp.isfinite(out))
    print("KERNEL_OK")
</pallas_src>

<mosaic_0001>
module attributes {stable_mosaic.version = 11 : i64} {
  func.func @attention_kernel(%arg0: i32, %arg1: i32, %arg2: memref<1x8x32xbf16, #tpu.memory_space<vmem>>, %arg3: memref<1x32xf32, #tpu.memory_space<vmem>>, %arg4: memref<1x32xf32, #tpu.memory_space<vmem>>, %arg5: memref<1x32xf32, #tpu.memory_space<vmem>>, %arg6: memref<1x32xf32, #tpu.memory_space<vmem>>, %arg7: memref<32x32xbf16, #tpu.memory_space<vmem>>, %arg8: memref<1x32xf32, #tpu.memory_space<vmem>>, %arg9: memref<32x32xbf16, #tpu.memory_space<vmem>>, %arg10: memref<1x32xf32, #tpu.memory_space<vmem>>, %arg11: memref<32x32xbf16, #tpu.memory_space<vmem>>, %arg12: memref<1x32xf32, #tpu.memory_space<vmem>>, %arg13: memref<32x32xbf16, #tpu.memory_space<vmem>>, %arg14: memref<1x32xf32, #tpu.memory_space<vmem>>, %arg15: memref<1x8x32xbf16, #tpu.memory_space<vmem>>, %arg16: memref<8x32xbf16, #tpu.memory_space<vmem>>, %arg17: memref<8x32xbf16, #tpu.memory_space<vmem>>, %arg18: memref<8x32xbf16, #tpu.memory_space<vmem>>) attributes {dimension_semantics = [#tpu.dimension_semantics<parallel>, #tpu.dimension_semantics<arbitrary>], iteration_bounds = array<i64: 2, 1>, scalar_prefetch = 0 : i64, scratch_operands = 3 : i64, tpu.core_type = #tpu.core_type<tc>, window_params = [{transform_indices = @transform_0, window_bounds = array<i64: 1, 8, 32>}, {pipeline_mode = #tpu.pipeline_mode<synchronous>, transform_indices = @transform_1, window_bounds = array<i64: 1, 32>}, {pipeline_mode = #tpu.pipeline_mode<synchronous>, transform_indices = @transform_2, window_bounds = array<i64: 1, 32>}, {pipeline_mode = #tpu.pipeline_mode<synchronous>, transform_indices = @transform_3, window_bounds = array<i64: 1, 32>}, {pipeline_mode = #tpu.pipeline_mode<synchronous>, transform_indices = @transform_4, window_bounds = array<i64: 1, 32>}, {pipeline_mode = #tpu.pipeline_mode<synchronous>, transform_indices = @transform_5, window_bounds = array<i64: 32, 32>}, {pipeline_mode = #tpu.pipeline_mode<synchronous>, transform_indices = @transform_6, window_bounds = array<i64: 1, 32>}, {pipeline_mode = #tpu.pipeline_mode<synchronous>, transform_indices = @transform_7, window_bounds = array<i64: 32, 32>}, {pipeline_mode = #tpu.pipeline_mode<synchronous>, transform_indices = @transform_8, window_bounds = array<i64: 1, 32>}, {pipeline_mode = #tpu.pipeline_mode<synchronous>, transform_indices = @transform_9, window_bounds = array<i64: 32, 32>}, {pipeline_mode = #tpu.pipeline_mode<synchronous>, transform_indices = @transform_10, window_bounds = array<i64: 1, 32>}, {pipeline_mode = #tpu.pipeline_mode<synchronous>, transform_indices = @transform_11, window_bounds = array<i64: 32, 32>}, {pipeline_mode = #tpu.pipeline_mode<synchronous>, transform_indices = @transform_12, window_bounds = array<i64: 1, 32>}, {transform_indices = @transform_13, window_bounds = array<i64: 1, 8, 32>}]} {
    %c0_i32 = arith.constant 0 : i32
    %0 = arith.cmpi eq, %arg1, %c0_i32 : i32
    %1 = arith.extui %0 : i1 to i32
    %c0_i32_0 = arith.constant 0 : i32
    %2 = arith.cmpi ne, %1, %c0_i32_0 : i32
    scf.if %2 {
      %c0_60 = arith.constant 0 : index
      %c0_61 = arith.constant 0 : index
      %c0_62 = arith.constant 0 : index
      %154 = vector.load %arg2[%c0_60, %c0_61, %c0_62] : memref<1x8x32xbf16, #tpu.memory_space<vmem>>, vector<1x8x32xbf16>
      %155 = vector.shape_cast %154 : vector<1x8x32xbf16> to vector<8x32xbf16>
      %156 = arith.extf %155 : vector<8x32xbf16> to vector<8x32xf32>
      %c0_63 = arith.constant 0 : index
      %c0_64 = arith.constant 0 : index
      %157 = vector.load %arg3[%c0_63, %c0_64] : memref<1x32xf32, #tpu.memory_space<vmem>>, vector<1x32xf32>
      %c0_65 = arith.constant 0 : index
      %c0_66 = arith.constant 0 : index
      %158 = vector.load %arg4[%c0_65, %c0_66] : memref<1x32xf32, #tpu.memory_space<vmem>>, vector<1x32xf32>
      %cst_67 = arith.constant dense<0.000000e+00> : vector<8xf32>
      %159 = vector.multi_reduction <add>, %156, %cst_67 [1] : vector<8x32xf32> to vector<8xf32>
      %160 = vector.shape_cast %159 : vector<8xf32> to vector<8x1xf32>
      %cst_68 = arith.constant 3.200000e+01 : f32
      %161 = vector.broadcast %cst_68 : f32 to vector<8x1xf32>
      %162 = arith.divf %160, %161 : vector<8x1xf32>
      %163 = vector.broadcast %162 : vector<8x1xf32> to vector<8x32xf32>
      %164 = arith.subf %156, %163 : vector<8x32xf32>
      %165 = arith.mulf %164, %164 : vector<8x32xf32>
      %cst_69 = arith.constant dense<0.000000e+00> : vector<8xf32>
      %166 = vector.multi_reduction <add>, %165, %cst_69 [1] : vector<8x32xf32> to vector<8xf32>
      %167 = vector.shape_cast %166 : vector<8xf32> to vector<8x1xf32>
      %cst_70 = arith.constant 3.200000e+01 : f32
      %168 = vector.broadcast %cst_70 : f32 to vector<8x1xf32>
      %169 = arith.divf %167, %168 : vector<8x1xf32>
      %170 = vector.broadcast %162 : vector<8x1xf32> to vector<8x32xf32>
      %171 = arith.subf %156, %170 : vector<8x32xf32>
      %cst_71 = arith.constant 9.99999996E-13 : f32
      %172 = vector.broadcast %cst_71 : f32 to vector<8x1xf32>
      %173 = arith.addf %169, %172 : vector<8x1xf32>
      %174 = math.rsqrt %173 : vector<8x1xf32>
      %175 = vector.broadcast %174 : vector<8x1xf32> to vector<8x32xf32>
      %176 = arith.mulf %171, %175 : vector<8x32xf32>
      %177 = vector.broadcast %157 : vector<1x32xf32> to vector<8x32xf32>
      %178 = arith.mulf %176, %177 : vector<8x32xf32>
      %179 = vector.broadcast %158 : vector<1x32xf32> to vector<8x32xf32>
      %180 = arith.addf %178, %179 : vector<8x32xf32>
      %c0_72 = arith.constant 0 : index
      %c0_73 = arith.constant 0 : index
      %181 = vector.load %arg5[%c0_72, %c0_73] : memref<1x32xf32, #tpu.memory_space<vmem>>, vector<1x32xf32>
      %c0_74 = arith.constant 0 : index
      %c0_75 = arith.constant 0 : index
      %182 = vector.load %arg6[%c0_74, %c0_75] : memref<1x32xf32, #tpu.memory_space<vmem>>, vector<1x32xf32>
      %cst_76 = arith.constant dense<0.000000e+00> : vector<8xf32>
      %183 = vector.multi_reduction <add>, %180, %cst_76 [1] : vector<8x32xf32> to vector<8xf32>
      %184 = vector.shape_cast %183 : vector<8xf32> to vector<8x1xf32>
      %cst_77 = arith.constant 3.200000e+01 : f32
      %185 = vector.broadcast %cst_77 : f32 to vector<8x1xf32>
      %186 = arith.divf %184, %185 : vector<8x1xf32>
      %187 = vector.broadcast %186 : vector<8x1xf32> to vector<8x32xf32>
      %188 = arith.subf %180, %187 : vector<8x32xf32>
      %189 = arith.mulf %188, %188 : vector<8x32xf32>
      %cst_78 = arith.constant dense<0.000000e+00> : vector<8xf32>
      %190 = vector.multi_reduction <add>, %189, %cst_78 [1] : vector<8x32xf32> to vector<8xf32>
      %191 = vector.shape_cast %190 : vector<8xf32> to vector<8x1xf32>
      %cst_79 = arith.constant 3.200000e+01 : f32
      %192 = vector.broadcast %cst_79 : f32 to vector<8x1xf32>
      %193 = arith.divf %191, %192 : vector<8x1xf32>
      %194 = vector.broadcast %186 : vector<8x1xf32> to vector<8x32xf32>
      %195 = arith.subf %180, %194 : vector<8x32xf32>
      %cst_80 = arith.constant 9.99999974E-6 : f32
      %196 = vector.broadcast %cst_80 : f32 to vector<8x1xf32>
      %197 = arith.addf %193, %196 : vector<8x1xf32>
      %198 = math.rsqrt %197 : vector<8x1xf32>
      %199 = vector.broadcast %198 : vector<8x1xf32> to vector<8x32xf32>
      %200 = arith.mulf %195, %199 : vector<8x32xf32>
      %201 = vector.broadcast %181 : vector<1x32xf32> to vector<8x32xf32>
      %202 = arith.mulf %200, %201 : vector<8x32xf32>
      %203 = vector.broadcast %182 : vector<1x32xf32> to vector<8x32xf32>
      %204 = arith.addf %202, %203 : vector<8x32xf32>
      %205 = arith.truncf %204 : vector<8x32xf32> to vector<8x32xbf16>
      %c0_81 = arith.constant 0 : index
      %c0_82 = arith.constant 0 : index
      %206 = vector.load %arg9[%c0_81, %c0_82] : memref<32x32xbf16, #tpu.memory_space<vmem>>, vector<32x32xbf16>
      %cst_83 = arith.constant dense<0.000000e+00> : vector<8x32xf32>
      %207 = tpu.matmul %205, %206, %cst_83 {dimension_numbers = #tpu.dot_dimension_numbers<[1], [0], [0], [1], [0, 0, 1, 1], [], []>} : vector<8x32xbf16>, vector<32x32xbf16>, vector<8x32xf32> -> vector<8x32xf32>
      %c0_84 = arith.constant 0 : index
      %c0_85 = arith.constant 0 : index
      %208 = vector.load %arg10[%c0_84, %c0_85] : memref<1x32xf32, #tpu.memory_space<vmem>>, vector<1x32xf32>
      %209 = vector.broadcast %208 : vector<1x32xf32> to vector<8x32xf32>
      %210 = arith.addf %207, %209 : vector<8x32xf32>
      %c0_86 = arith.constant 0 : index
      %c0_87 = arith.constant 0 : index
      %211 = vector.load %arg11[%c0_86, %c0_87] : memref<32x32xbf16, #tpu.memory_space<vmem>>, vector<32x32xbf16>
      %cst_88 = arith.constant dense<0.000000e+00> : vector<8x32xf32>
      %212 = tpu.matmul %205, %211, %cst_88 {dimension_numbers = #tpu.dot_dimension_numbers<[1], [0], [0], [1], [0, 0, 1, 1], [], []>} : vector<8x32xbf16>, vector<32x32xbf16>, vector<8x32xf32> -> vector<8x32xf32>
      %c0_89 = arith.constant 0 : index
      %c0_90 = arith.constant 0 : index
      %213 = vector.load %arg12[%c0_89, %c0_90] : memref<1x32xf32, #tpu.memory_space<vmem>>, vector<1x32xf32>
      %214 = vector.broadcast %213 : vector<1x32xf32> to vector<8x32xf32>
      %215 = arith.addf %212, %214 : vector<8x32xf32>
      %216 = arith.truncf %210 : vector<8x32xf32> to vector<8x32xbf16>
      %c0_91 = arith.constant 0 : index
      %c0_92 = arith.constant 0 : index
      %217 = vector.load %arg16[%c0_91, %c0_92] : memref<8x32xbf16, #tpu.memory_space<vmem>>, vector<8x32xbf16>
      tpu.vector_store %arg16[%c0_91, %c0_92], %216 {strides = array<i32>} : memref<8x32xbf16, #tpu.memory_space<vmem>>, vector<8x32xbf16>,
      %218 = arith.truncf %215 : vector<8x32xf32> to vector<8x32xbf16>
      %c0_93 = arith.constant 0 : index
      %c0_94 = arith.constant 0 : index
      %219 = vector.load %arg17[%c0_93, %c0_94] : memref<8x32xbf16, #tpu.memory_space<vmem>>, vector<8x32xbf16>
      tpu.vector_store %arg17[%c0_93, %c0_94], %218 {strides = array<i32>} : memref<8x32xbf16, #tpu.memory_space<vmem>>, vector<8x32xbf16>,
    } else {
    }
    %c8_i32 = arith.constant 8 : i32
    %3 = arith.muli %arg1, %c8_i32 : i32
    %4 = tpu.assume_multiple %3, 8 : i32
    %c0 = arith.constant 0 : index
    %5 = arith.index_cast %4 : i32 to index
    %c0_1 = arith.constant 0 : index
    %6 = vector.load %arg2[%c0, %5, %c0_1] : memref<1x8x32xbf16, #tpu.memory_space<vmem>>, vector<1x8x32xbf16>
    %7 = vector.shape_cast %6 : vector<1x8x32xbf16> to vector<8x32xbf16>
    %8 = arith.extf %7 : vector<8x32xbf16> to vector<8x32xf32>
    %c0_2 = arith.constant 0 : index
    %c0_3 = arith.constant 0 : index
    %9 = vector.load %arg3[%c0_2, %c0_3] : memref<1x32xf32, #tpu.memory_space<vmem>>, vector<1x32xf32>
    %c0_4 = arith.constant 0 : index
    %c0_5 = arith.constant 0 : index
    %10 = vector.load %arg4[%c0_4, %c0_5] : memref<1x32xf32, #tpu.memory_space<vmem>>, vector<1x32xf32>
    %cst = arith.constant dense<0.000000e+00> : vector<8xf32>
    %11 = vector.multi_reduction <add>, %8, %cst [1] : vector<8x32xf32> to vector<8xf32>
    %12 = vector.shape_cast %11 : vector<8xf32> to vector<8x1xf32>
    %cst_6 = arith.constant 3.200000e+01 : f32
    %13 = vector.broadcast %cst_6 : f32 to vector<8x1xf32>
    %14 = arith.divf %12, %13 : vector<8x1xf32>
    %15 = vector.broadcast %14 : vector<8x1xf32> to vector<8x32xf32>
    %16 = arith.subf %8, %15 : vector<8x32xf32>
    %17 = arith.mulf %16, %16 : vector<8x32xf32>
    %cst_7 = arith.constant dense<0.000000e+00> : vector<8xf32>
    %18 = vector.multi_reduction <add>, %17, %cst_7 [1] : vector<8x32xf32> to vector<8xf32>
    %19 = vector.shape_cast %18 : vector<8xf32> to vector<8x1xf32>
    %cst_8 = arith.constant 3.200000e+01 : f32
    %20 = vector.broadcast %cst_8 : f32 to vector<8x1xf32>
    %21 = arith.divf %19, %20 : vector<8x1xf32>
    %22 = vector.broadcast %14 : vector<8x1xf32> to vector<8x32xf32>
    %23 = arith.subf %8, %22 : vector<8x32xf32>
    %cst_9 = arith.constant 9.99999996E-13 : f32
    %24 = vector.broadcast %cst_9 : f32 to vector<8x1xf32>
    %25 = arith.addf %21, %24 : vector<8x1xf32>
    %26 = math.rsqrt %25 : vector<8x1xf32>
    %27 = vector.broadcast %26 : vector<8x1xf32> to vector<8x32xf32>
    %28 = arith.mulf %23, %27 : vector<8x32xf32>
    %29 = vector.broadcast %9 : vector<1x32xf32> to vector<8x32xf32>
    %30 = arith.mulf %28, %29 : vector<8x32xf32>
    %31 = vector.broadcast %10 : vector<1x32xf32> to vector<8x32xf32>
    %32 = arith.addf %30, %31 : vector<8x32xf32>
    %c0_10 = arith.constant 0 : index
    %c0_11 = arith.constant 0 : index
    %33 = vector.load %arg5[%c0_10, %c0_11] : memref<1x32xf32, #tpu.memory_space<vmem>>, vector<1x32xf32>
    %c0_12 = arith.constant 0 : index
    %c0_13 = arith.constant 0 : index
    %34 = vector.load %arg6[%c0_12, %c0_13] : memref<1x32xf32, #tpu.memory_space<vmem>>, vector<1x32xf32>
    %cst_14 = arith.constant dense<0.000000e+00> : vector<8xf32>
    %35 = vector.multi_reduction <add>, %32, %cst_14 [1] : vector<8x32xf32> to vector<8xf32>
    %36 = vector.shape_cast %35 : vector<8xf32> to vector<8x1xf32>
    %cst_15 = arith.constant 3.200000e+01 : f32
    %37 = vector.broadcast %cst_15 : f32 to vector<8x1xf32>
    %38 = arith.divf %36, %37 : vector<8x1xf32>
    %39 = vector.broadcast %38 : vector<8x1xf32> to vector<8x32xf32>
    %40 = arith.subf %32, %39 : vector<8x32xf32>
    %41 = arith.mulf %40, %40 : vector<8x32xf32>
    %cst_16 = arith.constant dense<0.000000e+00> : vector<8xf32>
    %42 = vector.multi_reduction <add>, %41, %cst_16 [1] : vector<8x32xf32> to vector<8xf32>
    %43 = vector.shape_cast %42 : vector<8xf32> to vector<8x1xf32>
    %cst_17 = arith.constant 3.200000e+01 : f32
    %44 = vector.broadcast %cst_17 : f32 to vector<8x1xf32>
    %45 = arith.divf %43, %44 : vector<8x1xf32>
    %46 = vector.broadcast %38 : vector<8x1xf32> to vector<8x32xf32>
    %47 = arith.subf %32, %46 : vector<8x32xf32>
    %cst_18 = arith.constant 9.99999974E-6 : f32
    %48 = vector.broadcast %cst_18 : f32 to vector<8x1xf32>
    %49 = arith.addf %45, %48 : vector<8x1xf32>
    %50 = math.rsqrt %49 : vector<8x1xf32>
    %51 = vector.broadcast %50 : vector<8x1xf32> to vector<8x32xf32>
    %52 = arith.mulf %47, %51 : vector<8x32xf32>
    %53 = vector.broadcast %33 : vector<1x32xf32> to vector<8x32xf32>
    %54 = arith.mulf %52, %53 : vector<8x32xf32>
    %55 = vector.broadcast %34 : vector<1x32xf32> to vector<8x32xf32>
    %56 = arith.addf %54, %55 : vector<8x32xf32>
    %57 = arith.truncf %56 : vector<8x32xf32> to vector<8x32xbf16>
    %c0_19 = arith.constant 0 : index
    %c0_20 = arith.constant 0 : index
    %58 = vector.load %arg7[%c0_19, %c0_20] : memref<32x32xbf16, #tpu.memory_space<vmem>>, vector<32x32xbf16>
    %cst_21 = arith.constant dense<0.000000e+00> : vector<8x32xf32>
    %59 = tpu.matmul %57, %58, %cst_21 {dimension_numbers = #tpu.dot_dimension_numbers<[1], [0], [0], [1], [0, 0, 1, 1], [], []>} : vector<8x32xbf16>, vector<32x32xbf16>, vector<8x32xf32> -> vector<8x32xf32>
    %c0_22 = arith.constant 0 : index
    %c0_23 = arith.constant 0 : index
    %60 = vector.load %arg8[%c0_22, %c0_23] : memref<1x32xf32, #tpu.memory_space<vmem>>, vector<1x32xf32>
    %61 = vector.broadcast %60 : vector<1x32xf32> to vector<8x32xf32>
    %62 = arith.addf %59, %61 : vector<8x32xf32>
    %cst_24 = arith.constant 0.353553385 : f32
    %63 = vector.broadcast %cst_24 : f32 to vector<8x32xf32>
    %64 = arith.mulf %62, %63 : vector<8x32xf32>
    %c0_25 = arith.constant 0 : index
    %c0_26 = arith.constant 0 : index
    %65 = vector.load %arg16[%c0_25, %c0_26] : memref<8x32xbf16, #tpu.memory_space<vmem>>, vector<8x32xbf16>
    %c0_27 = arith.constant 0 : index
    %c0_28 = arith.constant 0 : index
    %66 = vector.load %arg17[%c0_27, %c0_28] : memref<8x32xbf16, #tpu.memory_space<vmem>>, vector<8x32xbf16>
    %67 = vector.extract_strided_slice %64 {offsets = [0, 0], sizes = [8, 8], strides = [1, 1]} : vector<8x32xf32> to vector<8x8xf32>
    %68 = arith.truncf %67 : vector<8x8xf32> to vector<8x8xbf16>
    %69 = vector.extract_strided_slice %65 {offsets = [0, 0], sizes = [8, 8], strides = [1, 1]} : vector<8x32xbf16> to vector<8x8xbf16>
    %70 = vector.extract_strided_slice %66 {offsets = [0, 0], sizes = [8, 8], strides = [1, 1]} : vector<8x32xbf16> to vector<8x8xbf16>
    %cst_29 = arith.constant dense<0.000000e+00> : vector<8x8xf32>
    %71 = tpu.matmul %68, %69, %cst_29 {dimension_numbers = #tpu.dot_dimension_numbers<[1], [1], [0], [0], [0, 0, 1, 0], [], []>} : vector<8x8xbf16>, vector<8x8xbf16>, vector<8x8xf32> -> vector<8x8xf32>
    %cst_30 = arith.constant dense<0xFF800000> : vector<8xf32>
    %72 = vector.multi_reduction <maximumf>, %71, %cst_30 [1] : vector<8x8xf32> to vector<8xf32>
    %73 = vector.shape_cast %72 : vector<8xf32> to vector<8x1xf32>
    %74 = vector.broadcast %73 : vector<8x1xf32> to vector<8x8xf32>
    %75 = arith.subf %71, %74 : vector<8x8xf32>
    %76 = math.exp %75 : vector<8x8xf32>
    %cst_31 = arith.constant dense<0.000000e+00> : vector<8xf32>
    %77 = vector.multi_reduction <add>, %76, %cst_31 [1] : vector<8x8xf32> to vector<8xf32>
    %78 = vector.shape_cast %77 : vector<8xf32> to vector<8x1xf32>
    %79 = tpu.reciprocal %78 {approx = true} : vector<8x1xf32> -> vector<8x1xf32>
    %80 = vector.broadcast %79 : vector<8x1xf32> to vector<8x8xf32>
    %81 = arith.mulf %76, %80 : vector<8x8xf32>
    %82 = arith.truncf %81 : vector<8x8xf32> to vector<8x8xbf16>
    %cst_32 = arith.constant dense<0.000000e+00> : vector<8x8xf32>
    %83 = tpu.matmul %82, %70, %cst_32 {dimension_numbers = #tpu.dot_dimension_numbers<[1], [0], [0], [1], [0, 0, 1, 1], [], []>} : vector<8x8xbf16>, vector<8x8xbf16>, vector<8x8xf32> -> vector<8x8xf32>
    %84 = arith.truncf %83 : vector<8x8xf32> to vector<8x8xbf16>
    %c0_33 = arith.constant 0 : index
    %c0_34 = arith.constant 0 : index
    %85 = vector.load %arg18[%c0_33, %c0_34] : memref<8x32xbf16, #tpu.memory_space<vmem>>, vector<8x8xbf16>
    tpu.vector_store %arg18[%c0_33, %c0_34], %84 {strides = array<i32>} : memref<8x32xbf16, #tpu.memory_space<vmem>>, vector<8x8xbf16>,
    %86 = vector.extract_strided_slice %64 {offsets = [0, 8], sizes = [8, 8], strides = [1, 1]} : vector<8x32xf32> to vector<8x8xf32>
    %87 = arith.truncf %86 : vector<8x8xf32> to vector<8x8xbf16>
    %88 = vector.extract_strided_slice %65 {offsets = [0, 8], sizes = [8, 8], strides = [1, 1]} : vector<8x32xbf16> to vector<8x8xbf16>
    %89 = vector.extract_strided_slice %66 {offsets = [0, 8], sizes = [8, 8], strides = [1, 1]} : vector<8x32xbf16> to vector<8x8xbf16>
    %cst_35 = arith.constant dense<0.000000e+00> : vector<8x8xf32>
    %90 = tpu.matmul %87, %88, %cst_35 {dimension_numbers = #tpu.dot_dimension_numbers<[1], [1], [0], [0], [0, 0, 1, 0], [], []>} : vector<8x8xbf16>, vector<8x8xbf16>, vector<8x8xf32> -> vector<8x8xf32>
    %cst_36 = arith.constant dense<0xFF800000> : vector<8xf32>
    %91 = vector.multi_reduction <maximumf>, %90, %cst_36 [1] : vector<8x8xf32> to vector<8xf32>
    %92 = vector.shape_cast %91 : vector<8xf32> to vector<8x1xf32>
    %93 = vector.broadcast %92 : vector<8x1xf32> to vector<8x8xf32>
    %94 = arith.subf %90, %93 : vector<8x8xf32>
    %95 = math.exp %94 : vector<8x8xf32>
    %cst_37 = arith.constant dense<0.000000e+00> : vector<8xf32>
    %96 = vector.multi_reduction <add>, %95, %cst_37 [1] : vector<8x8xf32> to vector<8xf32>
    %97 = vector.shape_cast %96 : vector<8xf32> to vector<8x1xf32>
    %98 = tpu.reciprocal %97 {approx = true} : vector<8x1xf32> -> vector<8x1xf32>
    %99 = vector.broadcast %98 : vector<8x1xf32> to vector<8x8xf32>
    %100 = arith.mulf %95, %99 : vector<8x8xf32>
    %101 = arith.truncf %100 : vector<8x8xf32> to vector<8x8xbf16>
    %cst_38 = arith.constant dense<0.000000e+00> : vector<8x8xf32>
    %102 = tpu.matmul %101, %89, %cst_38 {dimension_numbers = #tpu.dot_dimension_numbers<[1], [0], [0], [1], [0, 0, 1, 1], [], []>} : vector<8x8xbf16>, vector<8x8xbf16>, vector<8x8xf32> -> vector<8x8xf32>
    %103 = arith.truncf %102 : vector<8x8xf32> to vector<8x8xbf16>
    %c0_39 = arith.constant 0 : index
    %c8 = arith.constant 8 : index
    %104 = vector.load %arg18[%c0_39, %c8] : memref<8x32xbf16, #tpu.memory_space<vmem>>, vector<8x8xbf16>
    tpu.vector_store %arg18[%c0_39, %c8], %103 {strides = array<i32>} : memref<8x32xbf16, #tpu.memory_space<vmem>>, vector<8x8xbf16>,
    %105 = vector.extract_strided_slice %64 {offsets = [0, 16], sizes = [8, 8], strides = [1, 1]} : vector<8x32xf32> to vector<8x8xf32>
    %106 = arith.truncf %105 : vector<8x8xf32> to vector<8x8xbf16>
    %107 = vector.extract_strided_slice %65 {offsets = [0, 16], sizes = [8, 8], strides = [1, 1]} : vector<8x32xbf16> to vector<8x8xbf16>
    %108 = vector.extract_strided_slice %66 {offsets = [0, 16], sizes = [8, 8], strides = [1, 1]} : vector<8x32xbf16> to vector<8x8xbf16>
    %cst_40 = arith.constant dense<0.000000e+00> : vector<8x8xf32>
    %109 = tpu.matmul %106, %107, %cst_40 {dimension_numbers = #tpu.dot_dimension_numbers<[1], [1], [0], [0], [0, 0, 1, 0], [], []>} : vector<8x8xbf16>, vector<8x8xbf16>, vector<8x8xf32> -> vector<8x8xf32>
    %cst_41 = arith.constant dense<0xFF800000> : vector<8xf32>
    %110 = vector.multi_reduction <maximumf>, %109, %cst_41 [1] : vector<8x8xf32> to vector<8xf32>
    %111 = vector.shape_cast %110 : vector<8xf32> to vector<8x1xf32>
    %112 = vector.broadcast %111 : vector<8x1xf32> to vector<8x8xf32>
    %113 = arith.subf %109, %112 : vector<8x8xf32>
    %114 = math.exp %113 : vector<8x8xf32>
    %cst_42 = arith.constant dense<0.000000e+00> : vector<8xf32>
    %115 = vector.multi_reduction <add>, %114, %cst_42 [1] : vector<8x8xf32> to vector<8xf32>
    %116 = vector.shape_cast %115 : vector<8xf32> to vector<8x1xf32>
    %117 = tpu.reciprocal %116 {approx = true} : vector<8x1xf32> -> vector<8x1xf32>
    %118 = vector.broadcast %117 : vector<8x1xf32> to vector<8x8xf32>
    %119 = arith.mulf %114, %118 : vector<8x8xf32>
    %120 = arith.truncf %119 : vector<8x8xf32> to vector<8x8xbf16>
    %cst_43 = arith.constant dense<0.000000e+00> : vector<8x8xf32>
    %121 = tpu.matmul %120, %108, %cst_43 {dimension_numbers = #tpu.dot_dimension_numbers<[1], [0], [0], [1], [0, 0, 1, 1], [], []>} : vector<8x8xbf16>, vector<8x8xbf16>, vector<8x8xf32> -> vector<8x8xf32>
    %122 = arith.truncf %121 : vector<8x8xf32> to vector<8x8xbf16>
    %c0_44 = arith.constant 0 : index
    %c16 = arith.constant 16 : index
    %123 = vector.load %arg18[%c0_44, %c16] : memref<8x32xbf16, #tpu.memory_space<vmem>>, vector<8x8xbf16>
    tpu.vector_store %arg18[%c0_44, %c16], %122 {strides = array<i32>} : memref<8x32xbf16, #tpu.memory_space<vmem>>, vector<8x8xbf16>,
    %124 = vector.extract_strided_slice %64 {offsets = [0, 24], sizes = [8, 8], strides = [1, 1]} : vector<8x32xf32> to vector<8x8xf32>
    %125 = arith.truncf %124 : vector<8x8xf32> to vector<8x8xbf16>
    %126 = vector.extract_strided_slice %65 {offsets = [0, 24], sizes = [8, 8], strides = [1, 1]} : vector<8x32xbf16> to vector<8x8xbf16>
    %127 = vector.extract_strided_slice %66 {offsets = [0, 24], sizes = [8, 8], strides = [1, 1]} : vector<8x32xbf16> to vector<8x8xbf16>
    %cst_45 = arith.constant dense<0.000000e+00> : vector<8x8xf32>
    %128 = tpu.matmul %125, %126, %cst_45 {dimension_numbers = #tpu.dot_dimension_numbers<[1], [1], [0], [0], [0, 0, 1, 0], [], []>} : vector<8x8xbf16>, vector<8x8xbf16>, vector<8x8xf32> -> vector<8x8xf32>
    %cst_46 = arith.constant dense<0xFF800000> : vector<8xf32>
    %129 = vector.multi_reduction <maximumf>, %128, %cst_46 [1] : vector<8x8xf32> to vector<8xf32>
    %130 = vector.shape_cast %129 : vector<8xf32> to vector<8x1xf32>
    %131 = vector.broadcast %130 : vector<8x1xf32> to vector<8x8xf32>
    %132 = arith.subf %128, %131 : vector<8x8xf32>
    %133 = math.exp %132 : vector<8x8xf32>
    %cst_47 = arith.constant dense<0.000000e+00> : vector<8xf32>
    %134 = vector.multi_reduction <add>, %133, %cst_47 [1] : vector<8x8xf32> to vector<8xf32>
    %135 = vector.shape_cast %134 : vector<8xf32> to vector<8x1xf32>
    %136 = tpu.reciprocal %135 {approx = true} : vector<8x1xf32> -> vector<8x1xf32>
    %137 = vector.broadcast %136 : vector<8x1xf32> to vector<8x8xf32>
    %138 = arith.mulf %133, %137 : vector<8x8xf32>
    %139 = arith.truncf %138 : vector<8x8xf32> to vector<8x8xbf16>
    %cst_48 = arith.constant dense<0.000000e+00> : vector<8x8xf32>
    %140 = tpu.matmul %139, %127, %cst_48 {dimension_numbers = #tpu.dot_dimension_numbers<[1], [0], [0], [1], [0, 0, 1, 1], [], []>} : vector<8x8xbf16>, vector<8x8xbf16>, vector<8x8xf32> -> vector<8x8xf32>
    %141 = arith.truncf %140 : vector<8x8xf32> to vector<8x8xbf16>
    %c0_49 = arith.constant 0 : index
    %c24 = arith.constant 24 : index
    %142 = vector.load %arg18[%c0_49, %c24] : memref<8x32xbf16, #tpu.memory_space<vmem>>, vector<8x8xbf16>
    tpu.vector_store %arg18[%c0_49, %c24], %141 {strides = array<i32>} : memref<8x32xbf16, #tpu.memory_space<vmem>>, vector<8x8xbf16>,
    %c0_50 = arith.constant 0 : index
    %c0_51 = arith.constant 0 : index
    %143 = vector.load %arg18[%c0_50, %c0_51] : memref<8x32xbf16, #tpu.memory_space<vmem>>, vector<8x32xbf16>
    %c0_52 = arith.constant 0 : index
    %c0_53 = arith.constant 0 : index
    %144 = vector.load %arg13[%c0_52, %c0_53] : memref<32x32xbf16, #tpu.memory_space<vmem>>, vector<32x32xbf16>
    %cst_54 = arith.constant dense<0.000000e+00> : vector<8x32xf32>
    %145 = tpu.matmul %143, %144, %cst_54 {dimension_numbers = #tpu.dot_dimension_numbers<[1], [0], [0], [1], [0, 0, 1, 1], [], []>} : vector<8x32xbf16>, vector<32x32xbf16>, vector<8x32xf32> -> vector<8x32xf32>
    %c0_55 = arith.constant 0 : index
    %c0_56 = arith.constant 0 : index
    %146 = vector.load %arg14[%c0_55, %c0_56] : memref<1x32xf32, #tpu.memory_space<vmem>>, vector<1x32xf32>
    %147 = vector.broadcast %146 : vector<1x32xf32> to vector<8x32xf32>
    %148 = arith.addf %145, %147 : vector<8x32xf32>
    %149 = arith.addf %32, %148 : vector<8x32xf32>
    %150 = arith.truncf %149 : vector<8x32xf32> to vector<8x32xbf16>
    %c0_57 = arith.constant 0 : index
    %c0_58 = arith.constant 0 : index
    %c0_59 = arith.constant 0 : index
    %151 = vector.load %arg15[%c0_57, %c0_58, %c0_59] : memref<1x8x32xbf16, #tpu.memory_space<vmem>>, vector<1x8x32xbf16>
    %152 = vector.shape_cast %151 : vector<1x8x32xbf16> to vector<8x32xbf16>
    %153 = vector.shape_cast %150 : vector<8x32xbf16> to vector<1x8x32xbf16>
    tpu.vector_store %arg15[%c0_57, %c0_58, %c0_59], %153 {strides = array<i32>} : memref<1x8x32xbf16, #tpu.memory_space<vmem>>, vector<1x8x32xbf16>,
    return
  }
  func.func @transform_0(%arg0: i32, %arg1: i32) -> (i32, i32, i32) {
    %c0_i32 = arith.constant 0 : i32
    %c0_i32_0 = arith.constant 0 : i32
    %c0_i32_1 = arith.constant 0 : i32
    return %arg0, %c0_i32, %c0_i32_0 : i32, i32, i32
  }
  func.func @transform_1(%arg0: i32, %arg1: i32) -> (i32, i32) {
    %c0_i32 = arith.constant 0 : i32
    %c0_i32_0 = arith.constant 0 : i32
    %c0_i32_1 = arith.constant 0 : i32
    return %c0_i32, %c0_i32_0 : i32, i32
  }
  func.func @transform_2(%arg0: i32, %arg1: i32) -> (i32, i32) {
    %c0_i32 = arith.constant 0 : i32
    %c0_i32_0 = arith.constant 0 : i32
    %c0_i32_1 = arith.constant 0 : i32
    return %c0_i32, %c0_i32_0 : i32, i32
  }
  func.func @transform_3(%arg0: i32, %arg1: i32) -> (i32, i32) {
    %c0_i32 = arith.constant 0 : i32
    %c0_i32_0 = arith.constant 0 : i32
    %c0_i32_1 = arith.constant 0 : i32
    return %c0_i32, %c0_i32_0 : i32, i32
  }
  func.func @transform_4(%arg0: i32, %arg1: i32) -> (i32, i32) {
    %c0_i32 = arith.constant 0 : i32
    %c0_i32_0 = arith.constant 0 : i32
    %c0_i32_1 = arith.constant 0 : i32
    return %c0_i32, %c0_i32_0 : i32, i32
  }
  func.func @transform_5(%arg0: i32, %arg1: i32) -> (i32, i32) {
    %c0_i32 = arith.constant 0 : i32
    %c0_i32_0 = arith.constant 0 : i32
    %c0_i32_1 = arith.constant 0 : i32
    return %c0_i32, %c0_i32_0 : i32, i32
  }
  func.func @transform_6(%arg0: i32, %arg1: i32) -> (i32, i32) {
    %c0_i32 = arith.constant 0 : i32
    %c0_i32_0 = arith.constant 0 : i32
    %c0_i32_1 = arith.constant 0 : i32
    return %c0_i32, %c0_i32_0 : i32, i32
  }
  func.func @transform_7(%arg0: i32, %arg1: i32) -> (i32, i32) {
    %c0_i32 = arith.constant 0 : i32
    %c0_i32_0 = arith.constant 0 : i32
    %c0_i32_1 = arith.constant 0 : i32
    return %c0_i32, %c0_i32_0 : i32, i32
  }
  func.func @transform_8(%arg0: i32, %arg1: i32) -> (i32, i32) {
    %c0_i32 = arith.constant 0 : i32
    %c0_i32_0 = arith.constant 0 : i32
    %c0_i32_1 = arith.constant 0 : i32
    return %c0_i32, %c0_i32_0 : i32, i32
  }
  func.func @transform_9(%arg0: i32, %arg1: i32) -> (i32, i32) {
    %c0_i32 = arith.constant 0 : i32
    %c0_i32_0 = arith.constant 0 : i32
    %c0_i32_1 = arith.constant 0 : i32
    return %c0_i32, %c0_i32_0 : i32, i32
  }
  func.func @transform_10(%arg0: i32, %arg1: i32) -> (i32, i32) {
    %c0_i32 = arith.constant 0 : i32
    %c0_i32_0 = arith.constant 0 : i32
    %c0_i32_1 = arith.constant 0 : i32
    return %c0_i32, %c0_i32_0 : i32, i32
  }
  func.func @transform_11(%arg0: i32, %arg1: i32) -> (i32, i32) {
    %c0_i32 = arith.constant 0 : i32
    %c0_i32_0 = arith.constant 0 : i32
    %c0_i32_1 = arith.constant 0 : i32
    return %c0_i32, %c0_i32_0 : i32, i32
  }
  func.func @transform_12(%arg0: i32, %arg1: i32) -> (i32, i32) {
    %c0_i32 = arith.constant 0 : i32
    %c0_i32_0 = arith.constant 0 : i32
    %c0_i32_1 = arith.constant 0 : i32
    return %c0_i32, %c0_i32_0 : i32, i32
  }
  func.func @transform_13(%arg0: i32, %arg1: i32) -> (i32, i32, i32) {
    %c0_i32 = arith.constant 0 : i32
    %c0_i32_0 = arith.constant 0 : i32
    return %arg0, %arg1, %c0_i32 : i32, i32, i32
  }
}

</mosaic_0001>

<bundles_post_ra>
// kernel: tpu_custom_call.1
= control target key start
LH: loop header
LB: loop body
LE: loop exit
PB: predicated region body
PF: predicated region fallthrough
CT: control target
= control target key end

     0   :  { %s2768_s0 = inlined_call_operand.hbm [shape: bf16[2,8,32], index: 0, kind: input, shape index: {}]   ;;  %s2769_s1 = inlined_call_operand.vmem [shape: f32[1,32], index: 1, kind: input, shape index: {}]   ;;  %s2770_s2 = inlined_call_operand.vmem [shape: f32[1,32], index: 2, kind: input, shape index: {}]   ;;  %s2771_s3 = inlined_call_operand.hbm [shape: f32[1,32], index: 3, kind: input, shape index: {}]   ;;  %s2772_s4 = inlined_call_operand.hbm [shape: f32[1,32], index: 4, kind: input, shape index: {}]   ;;  %s2773_s5 = inlined_call_operand.vmem [shape: bf16[32,32], index: 5, kind: input, shape index: {}]   ;;  %s2774_s6 = inlined_call_operand.hbm [shape: f32[1,32], index: 6, kind: input, shape index: {}]   ;;  %s2775_s7 = inlined_call_operand.hbm [shape: bf16[32,32], index: 7, kind: input, shape index: {}]   ;;  %s2776_s8 = inlined_call_operand.hbm [shape: f32[1,32], index: 8, kind: input, shape index: {}]   ;;  %s2777_s9 = inlined_call_operand.vmem [shape: bf16[32,32], index: 9, kind: input, shape index: {}]   ;;  %s2778_s10 = inlined_call_operand.vmem [shape: f32[1,32], index: 10, kind: input, shape index: {}]   ;;  %s2779_s11 = inlined_call_operand.hbm [shape: bf16[32,32], index: 11, kind: input, shape index: {}]   ;;  %s2780_s12 = inlined_call_operand.vmem [shape: f32[1,32], index: 12, kind: input, shape index: {}]   ;;  %s2781_s13 = inlined_call_operand.hbm [shape: bf16[2,8,32], index: 13, kind: output, shape index: {}]  }
   0x1   :  { %2789 = sst [smem:[#allocation24_spill]] %s2771_s3 }
   0x2   :  { %2790 = sst [smem:[#allocation25_spill]] %s2772_s4 }
   0x3   :  { %2791 = sst [smem:[#allocation26_spill]] %s2773_s5 }
   0x4   :  { %2792 = sst [smem:[#allocation27_spill]] %s2774_s6 }
   0x5   :  { %2793 = sst [smem:[#allocation28_spill]] %s2778_s10 }
   0x6   :  { %2794 = sst [smem:[#allocation29_spill]] %s2780_s12 }
   0x7   :  { %2795 = sst [smem:[#allocation30_spill]] %s2781_s13 }
   0x8   :  { %18 = vsyncpa [#allocation6], 0 }
   0x9   :  { %20 = vsyncpa [#allocation6 + $0x1], 0 }
   0xa   :  { %21 = vsyncpa [#allocation9], 0 }
   0xb   :  { %22 = vsyncpa [#allocation12], 0 }
   0xc   :  { %23 = vsyncpa [#allocation15], 0 }
   0xd   :  { %24 = vsyncpa [#allocation7], 0 }
   0xe   :  { %26 = vsyncpa [#allocation7 + $0x1], 0  ;;  %s2308_s25 = smov 0   ;;  %s2310_s26 = smov 0  }
   0xf   :  { %s2312_s27 = smov 0   ;;  %s2314_s28 = smov 0  }
  0x10   :  { %s2316_s29 = smov 0   ;;  %s2318_s30 = smov 0  }
  0x11 LB: > { %2796 = sst [smem:[#allocation23_spill]] %s2210_s28  ;;  %s2782_s14 = sadd.s32 4294967295, %s2218_s30   ;;  %s2218_s30 = sphi %s2318_s30, %s32_s30   ;;  %s2214_s29 = sphi %s2316_s29, %s2825_s29   ;;  %s2210_s28 = sphi %s2314_s28, %s2824_s28   ;;  %s2206_s27 = sphi %s2312_s27, %s2823_s27   ;;  %s2202_s26 = sphi %s2310_s26, %s2822_s26   ;;  %s2198_s25 = sphi %s2308_s25, %s2821_s25  }
  0x12   : > { %p1588_p0 = scmp.ge.s32.totalorder %s2218_s30, 1  ;;  %p2342_p1 = scmp.eq.s32.totalorder %s2782_s14, 0 }
  0x13   : > { %p355_p2 = scmp.lt.s32.totalorder %s2218_s30, 3  ;;  %s2220_s17 = smov [#allocation8]  }
  0x14   : > { %s2797_s15 = scalar_select %p2342_p1, 1, 0 }
  0x15   : > { %p2347_p3 = pnand %p1588_p0, %p355_p2  ;;  %s374_s18 = sshll.u32 %s2220_s17, 4  ;;  %s375_s18 = int_to_ptr.vmem [resolvable:$true] %s374_s18 }
  0x16   : > { %s2221_s19 = smov [#allocation11]   ;;  %s2222_s22 = smov [#allocation14]  }
  0x17   : > { %s2798_s16 = scalar_select %p2347_p3, 1, 0 }
  0x18   : > { %p1787_p5 = pneg %p2347_p3  ;;  %s399_s20 = sshll.u32 %s2221_s19, 4  ;;  %s2360_s20 = int_to_ptr.vmem [resolvable:$true] %s399_s20 }
  0x19   : > { %s423_s23 = sshll.u32 %s2222_s22, 4  ;;  %s2800_s3 = sld [smem:[#allocation24_spill]]  ;;  %s2362_s23 = int_to_ptr.vmem [resolvable:$true] %s423_s23 }
  0x1a   : > { %p2356_p6 = pnand %p1787_p5, %p2342_p1 }
  0x1c   : > { %p2372_p8 = pneg %p2356_p6 }
  0x1f   : > { %s1926_s14 = scalar_lea.hbm %s2800_s3, 16 }
  0x20   : > { %p1927_p7 = scmp.ne.s32.totalorder %s2800_s3, %s1926_s14  ;;  %p1933_p11 = scmp.lt.u32.totalorder %s1926_s14, %s2800_s3 }
  0x22   : > { %p1929_p9 = pnand %p2372_p8, %p1927_p7 }
  0x24   : > { %p1930_p10 = pneg %p1929_p9 }
  0x26   : > { %p1935_p12 = pnand %p1933_p11, %p1930_p10 }
  0x28   : > { %1938 = shalt.err (!%p1935_p12)
}
  0x29   : > { %s1939_s24 = scalar_lea.vmem %s375_s18, 16  ;;  %s1946_s12 = scalar_lea.vmem %s375_s18, 32 }
  0x2a   : > { %p1940_p13 = scmp.ne.s32.totalorder %s375_s18, %s1939_s24  ;;  %p1947_p5 = scmp.lt.s32.totalorder %s375_s18, %s375_s18 }
  0x2b   : > { %p1948_p4 = scmp.lt.s32.totalorder %s1946_s12, %s1939_s24 }
  0x2c   : > { %p1942_p0 = pnand %p1940_p13, %p2372_p8 }
  0x2d   : > { %p1949_p3 = por %p1948_p4, %p1947_p5 }
  0x2e   : > { %p1943_p2 = pneg %p1942_p0 }
  0x30   : > { %p1950_p1 = pnand %p1949_p3, %p1943_p2 }
  0x32   : > { %1953 = shalt.err (!%p1950_p1)
}
  0x33   : > { %1790 = dma.hbm_to_vmem [thread:$0]  (!%p2356_p6), %s2800_s3, 16, %s375_s18, [#allocation9]  }
  0x34   : > { %s2802_s6 = sld [smem:[#allocation27_spill]] }
  0x3a   : > { %s1954_s22 = scalar_lea.hbm %s2802_s6, 16 }
  0x3b   : > { %p1955_p7 = scmp.ne.s32.totalorder %s2802_s6, %s1954_s22  ;;  %p1961_p1 = scmp.lt.u32.totalorder %s1954_s22, %s2802_s6 }
  0x3d   : > { %p1957_p9 = pnand %p1955_p7, %p2372_p8 }
  0x3f   : > { %p1958_p4 = pneg %p1957_p9 }
  0x41   : > { %p1963_p3 = pnand %p1961_p1, %p1958_p4 }
  0x43   : > { %1966 = shalt.err (!%p1963_p3)
}
  0x44   : > { %s1967_s18 = scalar_lea.vmem %s2360_s20, 16  ;;  %s1974_s5 = scalar_lea.vmem %s2360_s20, 32 }
  0x45   : > { %p1968_p10 = scmp.ne.s32.totalorder %s2360_s20, %s1967_s18  ;;  %p1975_p13 = scmp.lt.s32.totalorder %s2360_s20, %s2360_s20 }
  0x46   : > { %p1976_p0 = scmp.lt.s32.totalorder %s1974_s5, %s1967_s18 }
  0x47   : > { %p1970_p11 = pnand %p1968_p10, %p2372_p8 }
  0x48   : > { %p1977_p2 = por %p1976_p0, %p1975_p13 }
  0x49   : > { %p1971_p12 = pneg %p1970_p11 }
  0x4b   : > { %p1978_p5 = pnand %p1977_p2, %p1971_p12 }
  0x4d   : > { %1981 = shalt.err (!%p1978_p5)
}
  0x4e   : > { %1796 = dma.hbm_to_vmem [thread:$0]  (!%p2356_p6), %s2802_s6, 16, %s2360_s20, [#allocation12]  }
  0x4f   : > { %s1982_s14 = scalar_lea.hbm %s2776_s8, 16 }
  0x50   : > { %p1983_p7 = scmp.ne.s32.totalorder %s2776_s8, %s1982_s14  ;;  %p1989_p1 = scmp.lt.u32.totalorder %s1982_s14, %s2776_s8 }
  0x52   : > { %p1985_p9 = pnand %p1983_p7, %p2372_p8 }
  0x54   : > { %p1986_p4 = pneg %p1985_p9 }
  0x56   : > { %p1991_p3 = pnand %p1989_p1, %p1986_p4 }
  0x58   : > { %1994 = shalt.err (!%p1991_p3)
}
  0x59   : > { %s1995_s20 = scalar_lea.vmem %s2362_s23, 16  ;;  %s2002_s5 = scalar_lea.vmem %s2362_s23, 32 }
  0x5a   : > { %p1996_p10 = scmp.ne.s32.totalorder %s2362_s23, %s1995_s20  ;;  %p2003_p13 = scmp.lt.s32.totalorder %s2362_s23, %s2362_s23 }
  0x5b   : > { %p2004_p0 = scmp.lt.s32.totalorder %s2002_s5, %s1995_s20 }
  0x5c   : > { %p1998_p11 = pnand %p1996_p10, %p2372_p8 }
  0x5d   : > { %p2005_p2 = por %p2004_p0, %p2003_p13 }
  0x5e   : > { %p1999_p12 = pneg %p1998_p11 }
  0x60   : > { %p2006_p5 = pnand %p2005_p2, %p1999_p12 }
  0x62   : > { %2009 = shalt.err (!%p2006_p5)
}
  0x63   : > { %1802 = dma.hbm_to_vmem [thread:$0]  (!%p2356_p6), %s2776_s8, 16, %s2362_s23, [#allocation15]  }
  0x64   : > { %s2223_s17 = smov [#allocation10]   ;;  %s2224_s14 = smov [#allocation13]  }
  0x65   : > { %s385_s28 = sshll.u32 %s2223_s17, 4  ;;  %s409_s22 = sshll.u32 %s2224_s14, 4  ;;  %s386_s28 = int_to_ptr.vmem [resolvable:$true] %s385_s28  ;;  %s410_s22 = int_to_ptr.vmem [resolvable:$true] %s409_s22 }
  0x66   : > { %s2803_s4 = sld [smem:[#allocation25_spill]] }
  0x6c   : > { %s2010_s18 = scalar_lea.hbm %s2803_s4, 16 }
  0x6d   : > { %p2011_p7 = scmp.ne.s32.totalorder %s2803_s4, %s2010_s18  ;;  %p2017_p1 = scmp.lt.u32.totalorder %s2010_s18, %s2803_s4 }
  0x6f   : > { %p2013_p9 = pnand %p2011_p7, %p2372_p8 }
  0x71   : > { %p2014_p4 = pneg %p2013_p9 }
  0x73   : > { %p2019_p3 = pnand %p2017_p1, %p2014_p4 }
  0x75   : > { %2022 = shalt.err (!%p2019_p3)
}
  0x76   : > { %s2023_s23 = scalar_lea.vmem %s386_s28, 16  ;;  %s2030_s13 = scalar_lea.vmem %s386_s28, 32 }
  0x77   : > { %p2024_p10 = scmp.ne.s32.totalorder %s386_s28, %s2023_s23  ;;  %p2031_p13 = scmp.lt.s32.totalorder %s386_s28, %s386_s28 }
  0x78   : > { %p2032_p0 = scmp.lt.s32.totalorder %s2030_s13, %s2023_s23 }
  0x79   : > { %p2026_p11 = pnand %p2024_p10, %p2372_p8 }
  0x7a   : > { %p2033_p2 = por %p2032_p0, %p2031_p13 }
  0x7b   : > { %p2027_p12 = pneg %p2026_p11 }
  0x7d   : > { %p2034_p5 = pnand %p2033_p2, %p2027_p12 }
  0x7f   : > { %2037 = shalt.err (!%p2034_p5)
}
  0x80   : > { %1793 = dma.hbm_to_vmem [thread:$0]  (!%p2356_p6), %s2803_s4, 16, %s386_s28, [#allocation9]  }
  0x81   : > { %s2038_s12 = scalar_lea.hbm %s2775_s7, 256 }
  0x82   : > { %p2039_p7 = scmp.ne.s32.totalorder %s2775_s7, %s2038_s12  ;;  %p2045_p1 = scmp.lt.u32.totalorder %s2038_s12, %s2775_s7 }
  0x84   : > { %p2041_p9 = pnand %p2039_p7, %p2372_p8 }
  0x86   : > { %p2042_p4 = pneg %p2041_p9 }
  0x88   : > { %p2047_p3 = pnand %p2045_p1, %p2042_p4 }
  0x8a   : > { %2050 = shalt.err (!%p2047_p3)
}
  0x8b   : > { %s2051_s23 = scalar_lea.vmem %s410_s22, 256  ;;  %p2059_p13 = scmp.lt.s32.totalorder %s410_s22, %s410_s22 }
  0x8c   : > { %p2052_p10 = scmp.ne.s32.totalorder %s410_s22, %s2051_s23  ;;  %p2060_p0 = scmp.lt.s32.totalorder %s2051_s23, %s2051_s23 }
  0x8e   : > { %p2054_p11 = pnand %p2052_p10, %p2372_p8  ;;  %p2061_p2 = por %p2060_p0, %p2059_p13 }
  0x90   : > { %p2055_p12 = pneg %p2054_p11 }
  0x92   : > { %p2062_p5 = pnand %p2061_p2, %p2055_p12 }
  0x94   : > { %2065 = shalt.err (!%p2062_p5)
}
  0x95   : > { %s2225_s28 = smov 64   ;;  %s2226_s13 = smov 4  }
  0x96   : > { %1799 = dma.hbm_to_vmem [thread:$0]  (!%p2356_p6), %s2775_s7, 256, %s410_s22, [#allocation12], %s2225_s28, %s2225_s28, %s2226_s13  }
  0x97   : > { %s2227_s3 = smov [#allocation16]   ;;  %s2066_s20 = scalar_lea.hbm %s2779_s11, 256 }
  0x98   : > { %s439_s24 = sshll.u32 %s2227_s3, 4  ;;  %p2067_p7 = scmp.ne.s32.totalorder %s2779_s11, %s2066_s20  ;;  %s440_s24 = int_to_ptr.vmem [resolvable:$true] %s439_s24 }
  0x99   : > { %p2073_p1 = scmp.lt.u32.totalorder %s2066_s20, %s2779_s11 }
  0x9a   : > { %p2069_p9 = pnand %p2067_p7, %p2372_p8 }
  0x9c   : > { %p2070_p4 = pneg %p2069_p9 }
  0x9e   : > { %p2075_p3 = pnand %p2073_p1, %p2070_p4 }
  0xa0   : > { %2078 = shalt.err (!%p2075_p3)
}
  0xa1   : > { %s2079_s22 = scalar_lea.vmem %s440_s24, 256  ;;  %p2087_p13 = scmp.lt.s32.totalorder %s440_s24, %s440_s24 }
  0xa2   : > { %p2080_p10 = scmp.ne.s32.totalorder %s440_s24, %s2079_s22  ;;  %p2088_p0 = scmp.lt.s32.totalorder %s2079_s22, %s2079_s22 }
  0xa4   : > { %p2082_p11 = pnand %p2080_p10, %p2372_p8  ;;  %p2089_p2 = por %p2088_p0, %p2087_p13 }
  0xa6   : > { %p2083_p12 = pneg %p2082_p11 }
  0xa8   : > { %p2090_p5 = pnand %p2089_p2, %p2083_p12 }
  0xaa   : > { %2093 = shalt.err (!%p2090_p5)
}
  0xab   : > { %1805 = dma.hbm_to_vmem [thread:$0]  (!%p2356_p6), %s2779_s11, 256, %s440_s24, [#allocation15], %s2225_s28, %s2225_s28, %s2226_s13  }
  0xac   : > { %s1587_s4 = sadd.s32 4294967294, %s2218_s30   ;;  %s44_s19 = sadd.s32 1, %s2214_s29 }
  0xad   : > { %p46_p8 = scmp.ge.s32.totalorder %s44_s19, 2  ;;  %s51_s21 = sadd.s32 1, %s2206_s27 }
  0xae   : > { %p58_p7 = scmp.ne.s32.totalorder %s2206_s27, %s2202_s26  ;;  %p59_p9 = scmp.eq.s32.totalorder %s2218_s30, 0 }
  0xaf   : > { %s2827_s19 = smov (%p46_p8, %s44_s19), 0  ;;  %p64_p1 = scmp.ne.s32.totalorder %s2202_s26, %s2198_s25 }
  0xb0   : > { %p2498_p4 = por %p59_p9, %p58_p7  ;;  %s48_s28 = ssub.s32 %s2214_s29, %s2827_s19 }
  0xb1   : > { %s2805_s13 = sadd.s32 4294967295, %s2218_s30   ;;  %p49_p3 = scmp.eq.s32.totalorder %s48_s28, 0 }
  0xb2   : > { %p342_p6 = scmp.eq.s32.totalorder %s2805_s13, 1  ;;  %p2806_p10 = scmp.ne.s32.totalorder %s2797_s15, 0 }
  0xb3   : > { %p348_p13 = scmp.eq.s32.totalorder %s1587_s4, 1  ;;  %p1820_p2 = scmp.lt.s32.totalorder %s2218_s30, 2 }
  0xb4   : > { %p2510_p11 = por %p2806_p10, %p64_p1  ;;  %p2514_p12 = por %p342_p6, %p58_p7 }
  0xb5   : > { %s2519_s18 = scalar_select %p49_p3, %s2206_s27, %s51_s21  }
  0xb6   : > { %s2808_s12 = scalar_select %p2514_p12, 1, 0 }
  0xb7   : > { %p2521_p0 = por %p348_p13, %p64_p1  ;;  %s456_s5 = sand.u32 1, %s2206_s27  }
  0xb8   : > { %s1597_s10 = sshll.u32 %s2214_s29, 6  ;;  %s1596_s23 = sshll.u32 %s456_s5, 2 }
  0xb9   : > { %s2809_s20 = scalar_select %p2521_p0, 1, 0 }
  0xba   : > { %s2531_s14 = scalar_lea.hbm %s2768_s0, %s1597_s10  ;;  %s460_s4 = scalar_lea.vmem [#allocation5], %s1596_s23 }
  0xbb   : > { %s467_s21 = sshll.u32 %s460_s4, 4  ;;  %p2535_p5 = pnand %p1820_p2, %p2498_p4  ;;  %s2539_s21 = int_to_ptr.vmem [resolvable:$true] %s467_s21 }
  0xbc   : > { %s457_s13 = scalar_lea.sflag [#allocation6], %s456_s5  ;;  %s2094_s6 = scalar_lea.hbm %s2531_s14, 64 }
  0xbd   : > { %p2095_p8 = scmp.ne.s32.totalorder %s2531_s14, %s2094_s6  ;;  %p2096_p7 = pneg %p2535_p5 }
  0xbe   : > { %s2099_s3 = scalar_lea.hbm %s2768_s0, 128  ;;  %p2100_p4 = scmp.lt.u32.totalorder %s2531_s14, %s2768_s0 }
  0xbf   : > { %p2097_p9 = pnand %p2096_p7, %p2095_p8  ;;  %p2101_p6 = scmp.lt.u32.totalorder %s2099_s3, %s2094_s6 }
  0xc0   : > { %p2103_p10 = scmp.lt.u32.totalorder %s2094_s6, %s2531_s14 }
  0xc1   : > { %p2098_p1 = pneg %p2097_p9  ;;  %p2102_p3 = por %p2101_p6, %p2100_p4 }
  0xc3   : > { %p2104_p13 = por %p2103_p10, %p2102_p3 }
  0xc5   : > { %p2105_p2 = pnand %p2104_p13, %p2098_p1 }
  0xc7   : > { %2108 = shalt.err (!%p2105_p2)
}
  0xc8   : > { %s2109_s5 = scalar_lea.vmem %s2539_s21, 64  ;;  %s2228_s4 = smov [#allocation5]  }
  0xc9   : > { %p2110_p8 = scmp.ne.s32.totalorder %s2539_s21, %s2109_s5  ;;  %s2114_s10 = sshll.u32 %s2228_s4, 4  ;;  %s2115_s10 = int_to_ptr.vmem [resolvable:$false] %s2114_s10 }
  0xca   : > { %s2116_s23 = scalar_lea.vmem %s2115_s10, 128  ;;  %p2117_p12 = scmp.lt.s32.totalorder %s2539_s21, %s2115_s10 }
  0xcb   : > { %p2112_p9 = pnand %p2110_p8, %p2096_p7  ;;  %p2118_p4 = scmp.lt.s32.totalorder %s2116_s23, %s2109_s5 }
  0xcd   : > { %p2113_p0 = pneg %p2112_p9  ;;  %p2119_p6 = por %p2118_p4, %p2117_p12 }
  0xcf   : > { %p2120_p3 = pnand %p2119_p6, %p2113_p0 }
  0xd1   : > { %2123 = shalt.err (!%p2120_p3)
}
  0xd2   : > { %1809 = dma.hbm_to_vmem [thread:$0]  (!%p2535_p5), %s2531_s14, 64, %s2539_s21, %s457_s13  }
  0xd3   : > { %p2811_p1 = scmp.ne.s32.totalorder %s2798_s16, 0 }
  0xd4   : > { %s2569_s6 = sand.u32 (!%p2811_p1), 1, %s2202_s26  }
  0xd5   : > { %476 = sbr.rel (%p2811_p1) target bundleno = 2358 (0x936), region = 72  ;;  %s1599_s3 = sshll.u32 (!%p2811_p1), %s2569_s6, 2 }
  0xd6   : > { %s479_s22 = scalar_lea.sflag (!%p2811_p1), [#allocation6], %s2569_s6  ;;  %s482_s17 = scalar_lea.vmem (!%p2811_p1), [#allocation5], %s1599_s3 }
  0xdc   : > { %2177 = dma.done.wait (%p2510_p11), %s479_s22, 64  }
  0xdd   : > { %2179 = vsyncadd (%p2510_p11), %s479_s22, 4294967232  ;;  %p2812_p12 = scmp.ne.s32.totalorder %s2797_s15, 0 }
  0xdf   : > { %2181 = dma.done.wait (%p2812_p12), [#allocation9], 32  }
  0xe0   : > { %2183 = vsyncadd (%p2812_p12), [#allocation9], 4294967264 }
  0xe1   : > { %2185 = dma.done.wait (%p2812_p12), [#allocation12], 272  }
  0xe2   : > { %2187 = vsyncadd (%p2812_p12), [#allocation12], 4294967024 }
  0xe3   : > { %2189 = dma.done.wait (%p2812_p12), [#allocation15], 272  }
  0xe4   : > { %2191 = vsyncadd (%p2812_p12), [#allocation15], 4294967024  ;;  %vm558_vm0 = vcmask 261120   ;;  %v554_v0 = vld [vmem:[%s482_s17] sm:$0xf]  ;;  %v1892_v44 = vld [vmem:[#allocation13] sm:$0xff]  }
  0xe5   : > { %v756_v1 = vld [vmem:[%s482_s17] sm:$0xf]  ;;  %v555_v2 = vunpack.c.l.bf16 %v554_v0  ;;  %v1607_v23 = vld [vmem:[%s2769_s1] ss:$0 sm:$0xff]  ;;  %v2229_v46 = vmov 0.0   ;;  %v1894_v47 = vld [vmem:[#allocation13 + $0x8] sm:$0xff]  }
  0xe6   : > { %v757_v3 = vunpack.c.l.bf16 %v756_v1  ;;  %v1608_v25 = vld [vmem:[%s2770_s2] ss:$0 sm:$0xff]  ;;  %1679 = vmatprep.subr.bf16.mxu0 %v2229_v46  ;;  %1687 = vmatprep.subr.bf16.mxu1 %v2229_v46  ;;  %v1895_v48 = vld [vmem:[%s2777_s9 + $0x8] sm:$0xff]   ;;  %vm2230_vm1 = vmmov 0   ;;  %v1609_v56 = vld [vmem:[#allocation8] ss:$0 sm:$0xff] }
  0xe7   : > { %v559_v4 = vsel %vm558_vm0, %v555_v2, 0.0  ;;  %v1893_v45 = vld [vmem:[%s2777_s9] sm:$0xff]   ;;  %1680 = vmatpush3.bf16.msra.mxu0 %v1892_v44  ;;  %1683 = vmatprep.mubr.msk.bf16.mxu0 %vm2230_vm1, %v2229_v46  ;;  %v1610_v58 = vld [vmem:[#allocation10] ss:$0 sm:$0xff]  ;;  %s2813_s23 = sld [smem:[#allocation26_spill]]  ;;  %s2814_s24 = sld [smem:[#allocation28_spill]] }
  0xe8   : > { %v761_v5 = vsel %vm558_vm0, %v757_v3, 0.0  ;;  %560 = vadd.xlane.f32.xlu0 %v559_v4  ;;  %1688 = vmatpush3.bf16.msra.mxu1 %v1893_v45  ;;  %vm747_vm2 = vcmask 257024   ;;  %vm889_vm3 = vcmask 64512   ;;  %vm951_vm4 = vcmask 1043456   ;;  %s2231_s14 = smov 120   ;;  %s2232_s21 = smov 104  }
  0xe9   : > { %1681 = vmatprep.subr.bf16.mxu0 %v2229_v46  ;;  %1689 = vmatprep.subr.bf16.mxu1 %v2229_v46  ;;  %s2233_s28 = smov 112   ;;  %vm996_vm5 = vcmask 60416   ;;  %s2234_s13 = smov 8   ;;  %vm1122_vm6 = vcmask 126016   ;;  %vm1241_vm7 = vcmask 191616   ;;  %vm1360_vm8 = vcmask 257216  }
  0xea   : > { %1691 = vmatprep.mubr.msk.bf16.mxu1 %vm2230_vm1, %v2229_v46  ;;  %s2235_s5 = smov 16   ;;  %s2236_s4 = smov 24  }
  0xeb   : > { %1682 = vmatpush3.bf16.msra.mxu0 %v1894_v47  ;;  %s2815_s10 = sld [smem:[#allocation23_spill]]  ;;  %s2816_s15 = sld [smem:[#allocation29_spill]] }
  0xec   : > { %762 = vadd.xlane.f32.xlu0 %v761_v5  ;;  %1690 = vmatpush3.bf16.msra.mxu1 %v1895_v48  ;;  %v1611_v5 = vld [vmem:[#allocation14] ss:$0 sm:$0xff]  ;;  %p2818_p0 = scmp.ne.s32.totalorder %s2808_s12, 0 }
  0xed   : > { %1695 = vmatprep.subr.bf16.mxu0 %v2229_v46  ;;  %1703 = vmatprep.subr.bf16.mxu1 %v2229_v46  ;;  %v1896_v63 = vld [vmem:[%s2813_s23] sm:$0xff]  }
  0xf1   : > { %s1645_s16 = sshll.u32 %s2815_s10, 6 }
 0x175   : > { %v561_v6 = vpop.xlane.xlu0 %560 }
 0x176   : > { %v563_v7 = vmul.f32 0.03125, %v561_v6  ;;  %v1615_v6 = vld [vmem:[%s2814_s24] ss:$0 sm:$0xff]  ;;  %s548_s24 = scalar_lea.vmem [#allocation17], %s1599_s3  ;;  %s2237_s3 = smov [#allocation17]  }
 0x177   : > { %s2128_s22 = sshll.u32 %s2237_s3, 4  ;;  %s2129_s22 = int_to_ptr.vmem [resolvable:$false] %s2128_s22 }
 0x178   : > { %v564_v8 = vsub.f32 %v555_v2, %v563_v7  ;;  %v1897_v2 = vld [vmem:[%s2813_s23 + $0x8] sm:$0xff]   ;;  %s2130_s17 = scalar_lea.vmem %s2129_s22, 128 }
 0x179   : > { %v763_v9 = vpop.xlane.xlu0 %762 }
 0x17a   : > { %v765_v10 = vmul.f32 0.03125, %v763_v9  ;;  %v565_v11 = vmul.f32 %v564_v8, %v564_v8 }
 0x17c   : > { %v766_v12 = vsub.f32 %v757_v3, %v765_v10  ;;  %v566_v13 = vsel %vm558_vm0, %v565_v11, 0.0 }
 0x17d   : > { %567 = vadd.xlane.f32.xlu1 %v566_v13 }
 0x17e   : > { %v767_v14 = vmul.f32 %v766_v12, %v766_v12 }
 0x180   : > { %v768_v15 = vsel %vm558_vm0, %v767_v14, 0.0 }
 0x181   : > { %769 = vadd.xlane.f32.xlu1 %v768_v15 }
 0x20a   : > { %v568_v16 = vpop.xlane.xlu1 %567 }
 0x20b   : > { %v569_v17 = vmul.f32 0.03125, %v568_v16 }
 0x20d   : > { %v570_v18 = vadd.f32 1e-12, %v569_v17 }
 0x20e   : > { %v770_v19 = vpop.xlane.xlu1 %769 }
 0x20f   : > { %1902 = vrsqrt.f32 %v570_v18  ;;  %v771_v20 = vmul.f32 0.03125, %v770_v19  ;;  %v1623_v19 = vld [vmem:[#allocation11] ss:$0 sm:$0xff] }
 0x211   : > { %v772_v21 = vadd.f32 1e-12, %v771_v20 }
 0x213   : > { %1904 = vrsqrt.f32 %v772_v21 }
 0x219   : > { %v1903_v22 = vpop.eup %1902 }
 0x21a   : > { %v572_v24 = vmul.f32 %v1903_v22, %v564_v8 }
 0x21c   : > { %v579_v26 = vmul.f32 %v1607_v23, %v572_v24 }
 0x21d   : > { %v1905_v27 = vpop.eup %1904 }
 0x21e   : > { %v586_v28 = vadd.f32 %v1608_v25, %v579_v26  ;;  %v774_v29 = vmul.f32 %v1905_v27, %v766_v12 }
 0x220   : > { %v589_v30 = vsel %vm558_vm0, %v586_v28, 0.0  ;;  %v781_v31 = vmul.f32 %v1607_v23, %v774_v29 }
 0x221   : > { %590 = vadd.xlane.f32.xlu0 %v589_v30 }
 0x222   : > { %v2602_v32 = vadd.f32 %v1608_v25, %v781_v31 }
 0x224   : > { %v791_v33 = vsel %vm558_vm0, %v2602_v32, 0.0 }
 0x225   : > { %792 = vadd.xlane.f32.xlu1 %v791_v33 }
 0x2ae   : > { %v591_v34 = vpop.xlane.xlu0 %590 }
 0x2af   : > { %v592_v35 = vmul.f32 0.03125, %v591_v34 }
 0x2b1   : > { %v593_v36 = vsub.f32 %v586_v28, %v592_v35 }
 0x2b2   : > { %v793_v37 = vpop.xlane.xlu1 %792 }
 0x2b3   : > { %v794_v38 = vmul.f32 0.03125, %v793_v37  ;;  %v594_v39 = vmul.f32 %v593_v36, %v593_v36 }
 0x2b5   : > { %v795_v40 = vsub.f32 %v2602_v32, %v794_v38  ;;  %v595_v41 = vsel %vm558_vm0, %v594_v39, 0.0 }
 0x2b6   : > { %596 = vadd.xlane.f32.xlu0 %v595_v41 }
 0x2b7   : > { %v796_v42 = vmul.f32 %v795_v40, %v795_v40 }
 0x2b9   : > { %v797_v43 = vsel %vm558_vm0, %v796_v42, 0.0 }
 0x2ba   : > { %798 = vadd.xlane.f32.xlu1 %v797_v43 }
 0x343   : > { %v597_v49 = vpop.xlane.xlu0 %596 }
 0x344   : > { %v598_v50 = vmul.f32 0.03125, %v597_v49 }
 0x346   : > { %v599_v51 = vadd.f32 1e-05, %v598_v50 }
 0x347   : > { %v799_v52 = vpop.xlane.xlu1 %798 }
 0x348   : > { %1906 = vrsqrt.f32 %v599_v51  ;;  %v800_v53 = vmul.f32 0.03125, %v799_v52 }
 0x34a   : > { %v801_v54 = vadd.f32 1e-05, %v800_v53 }
 0x34c   : > { %1908 = vrsqrt.f32 %v801_v54 }
 0x352   : > { %v1907_v55 = vpop.eup %1906 }
 0x353   : > { %v601_v57 = vmul.f32 %v1907_v55, %v593_v36 }
 0x355   : > { %v608_v59 = vmul.f32 %v1609_v56, %v601_v57 }
 0x356   : > { %v1909_v60 = vpop.eup %1908 }
 0x357   : > { %v803_v61 = vmul.f32 %v1909_v60, %v795_v40  ;;  %v615_v62 = vadd.f32 %v1610_v58, %v608_v59 }
 0x359   : > { %v616_v0 = vpack.c.bf16 %v615_v62, %v615_v62  ;;  %v810_v1 = vmul.f32 %v1609_v56, %v803_v61 }
 0x35b   : > { %1684 = vmatmul.mubr.msk.bf16.vlgmr.msra.gmra.mrb[0].mxu0 %vm558_vm0, %v616_v0  ;;  %1692 = vmatmul.mubr.msk.bf16.vlgmr.msra.gmra.mrb[0].mxu1 %vm558_vm0, %v616_v0  ;;  %v817_v3 = vadd.f32 %v1610_v58, %v810_v1 }
 0x35c   : > { %1696 = vmatpush3.bf16.msra.mxu0 %v1896_v63  ;;  %1699 = vmatprep.mubr.msk.bf16.mxu0 %vm2230_vm1, %v2229_v46 }
 0x35d   : > { %1697 = vmatprep.subr.bf16.mxu0 %v2229_v46  ;;  %1705 = vmatprep.mubr.msk.bf16.mxu1 %vm2230_vm1, %v2229_v46  ;;  %v818_v4 = vpack.c.bf16 %v817_v3, %v817_v3 }
 0x360   : > { %1698 = vmatpush3.bf16.msra.mxu0 %v1897_v2 }
 0x361   : > { %1709 = vmatprep.subr.bf16.mxu0 %v2229_v46 }
 0x363   : > { %1700 = vmatmul.mubr.msk.bf16.vlgmr.msra.gmra.mrb[4].mxu0 %vm558_vm0, %v818_v4 }
 0x364   : > { %1711 = vmatprep.mubr.msk.bf16.mxu0 %vm2230_vm1, %v2229_v46 }
 0x42e   : > { %v677_v7 = vpop.f32.mrb[0].mxu0  ;;  %v740_v8 = vpop.f32.mrb[0].mxu1 }
 0x42f   : > { %v678_v9 = vadd.f32 %v1611_v5, %v677_v7  ;;  %v741_v10 = vadd.f32 %v1615_v6, %v740_v8  ;;  %v1685_v11 = vpop.f32.mrb[1].mxu0  ;;  %v1693_v12 = vpop.f32.mrb[1].mxu1 }
 0x430   : > { %v680_v13 = vpop.f32.mrb[2].mxu0  ;;  %v743_v14 = vpop.f32.mrb[2].mxu1 }
 0x431   : > { %v746_v15 = vpack.c.bf16 %v678_v9, %v678_v9  ;;  %v749_v16 = vpack.c.bf16 %v741_v10, %v741_v10  ;;  %v1686_v17 = vpop.f32.mrb[3].mxu0  ;;  %v1694_v18 = vpop.f32.mrb[3].mxu1 }
 0x433   : > { %748 = vst.msk [vmem:[#allocation2] sm:$0xf] %vm747_vm2, %v746_v15  ;;  %750 = vst.msk [vmem:[#allocation3] sm:$0xf] %vm747_vm2, %v749_v16 }
 0x436   : > { %v879_v20 = vpop.f32.mrb[4].mxu0 }
 0x437   : > { %v880_v21 = vadd.f32 %v1623_v19, %v879_v20  ;;  %v1701_v22 = vpop.f32.mrb[5].mxu0 }
 0x438   : > { %v882_v23 = vpop.f32.mrb[6].mxu0 }
 0x439   : > { %v885_v24 = vmul.f32 0.35355338, %v880_v21  ;;  %v1702_v25 = vpop.f32.mrb[7].mxu0 }
 0x43a   : > { %v886_v26 = vld [vmem:[#allocation2] sm:$0xf]  ;;  %v2647_v27 = vld [vmem:[#allocation3] sm:$0xf] }
 0x43b   : > { %v888_v28 = vpack.c.bf16 %v885_v24, %v885_v24  ;;  %v894_v29 = vsel %vm889_vm3, %v886_v26, 0  ;;  %v953_v30 = vsel %vm951_vm4, %v2647_v27, 0  ;;  %v1629_v31 = vcombine.low %v886_v26, %v886_v26 }
 0x43c   : > { %1704 = vmatpush3.bf16.xpose.msra.mxu1 %v894_v29  ;;  %1710 = vmatpush3.bf16.msra.mxu0 %v953_v30  ;;  %v1631_v14 = vcombine.low %v2647_v27, %v2647_v27 }
 0x43d   : > { %1004 = vrot.lane.b32.xlu0 %v1629_v31, %s2231_s14  ;;  %999 = vrot.lane.b32.xlu1 %v888_v28, %s2231_s14 }
 0x43e   : > { %1715 = vmatprep.subr.bf16.mxu1 %v2229_v46  ;;  %1721 = vmatprep.subr.bf16.mxu0 %v2229_v46 }
 0x441   : > { %1245 = vrot.lane.b32.xlu0 %v1629_v31, %s2232_s21  ;;  %1126 = vrot.lane.b32.xlu1 %v1629_v31, %s2233_s28 }
 0x443   : > { %1706 = vmatmul.mubr.msk.bf16.vlgmr.msra.gmra.mrb[4].mxu1 %vm889_vm3, %v888_v28 }
 0x444   : > { %1717 = vmatprep.mubr.msk.bf16.mxu1 %vm2230_vm1, %v2229_v46 }
 0x445   : > { %1124 = vrot.lane.b32.xlu1 %v888_v28, %s2233_s28 }
 0x449   : > { %1243 = vrot.lane.b32.xlu1 %v888_v28, %s2232_s21 }
 0x4af   : > { %v1005_v33 = vpop.permute.xlu0 %1004  ;;  %v1000_v34 = vpop.permute.xlu1 %999 }
 0x4b0   : > { %v1010_v35 = vsel %vm889_vm3, %v1005_v33, 0 }
 0x4b1   : > { %1716 = vmatpush3.bf16.xpose.msra.mxu1 %v1010_v35 }
 0x4b2   : > { %1727 = vmatprep.subr.bf16.mxu1 %v2229_v46 }
 0x4b3   : > { %v1127_v36 = vpop.permute.xlu1 %1126  ;;  %v1246_v38 = vpop.permute.xlu0 %1245 }
 0x4b4   : > { %v1132_v37 = vsel %vm889_vm3, %v1127_v36, 0  ;;  %v1251_v40 = vsel %vm889_vm3, %v1246_v38, 0 }
 0x4b7   : > { %v1125_v39 = vpop.permute.xlu1 %1124 }
 0x4b8   : > { %1718 = vmatmul.mubr.msk.bf16.vlgmr.msra.gmra.mrb[8].mxu1 %vm889_vm3, %v1000_v34 }
 0x4b9   : > { %1728 = vmatpush3.bf16.xpose.msra.mxu1 %v1132_v37  ;;  %1729 = vmatprep.mubr.msk.bf16.mxu1 %vm2230_vm1, %v2229_v46 }
 0x4ba   : > { %1739 = vmatprep.subr.bf16.mxu1 %v2229_v46 }
 0x4bb   : > { %v1244_v41 = vpop.permute.xlu1 %1243 }
 0x4c0   : > { %1730 = vmatmul.mubr.msk.bf16.vlgmr.msra.gmra.mrb[12].mxu1 %vm889_vm3, %v1125_v39 }
 0x4c1   : > { %1740 = vmatpush3.bf16.xpose.msra.mxu1 %v1251_v40  ;;  %1741 = vmatprep.mubr.msk.bf16.mxu1 %vm2230_vm1, %v2229_v46 }
 0x4c2   : > { %1751 = vmatprep.subr.bf16.mxu1 %v2229_v46 }
 0x4c8   : > { %1742 = vmatmul.mubr.msk.bf16.vlgmr.msra.gmra.mrb[16].mxu1 %vm889_vm3, %v1244_v41 }
 0x4c9   : > { %1755 = vmatprep.mubr.msk.bf16.mxu1 %vm2230_vm1, %v2229_v46 }
 0x516   : > { %v930_v42 = vpop.f32.mrb[4].mxu1 }
 0x517   : > { %v1707_v43 = vpop.f32.mrb[5].mxu1  ;;  %v936_v44 = vsel %vm889_vm3, %v930_v42, -inf }
 0x518   : > { %937 = vmax.xlane.f32.xlu0 %v936_v44  ;;  %v933_v45 = vpop.f32.mrb[6].mxu1 }
 0x519   : > { %v1708_v47 = vpop.f32.mrb[7].mxu1 }
 0x58b   : > { %v1046_v48 = vpop.f32.mrb[8].mxu1 }
 0x58c   : > { %v1719_v49 = vpop.f32.mrb[9].mxu1  ;;  %v1052_v50 = vsel %vm889_vm3, %v1046_v48, -inf }
 0x58d   : > { %1053 = vmax.xlane.f32.xlu1 %v1052_v50  ;;  %v1049_v51 = vpop.f32.mrb[10].mxu1 }
 0x58e   : > { %v1720_v52 = vpop.f32.mrb[11].mxu1 }
 0x593   : > { %v1168_v53 = vpop.f32.mrb[12].mxu1 }
 0x594   : > { %v1731_v54 = vpop.f32.mrb[13].mxu1  ;;  %v1174_v55 = vsel %vm889_vm3, %v1168_v53, -inf }
 0x595   : > { %1175 = vmax.xlane.f32.xlu0 %v1174_v55  ;;  %v1171_v56 = vpop.f32.mrb[14].mxu1 }
 0x596   : > { %v1732_v57 = vpop.f32.mrb[15].mxu1 }
 0x59b   : > { %v1287_v58 = vpop.f32.mrb[16].mxu1 }
 0x59c   : > { %v1743_v59 = vpop.f32.mrb[17].mxu1  ;;  %v1293_v60 = vsel %vm889_vm3, %v1287_v58, -inf }
 0x59d   : > { %1294 = vmax.xlane.f32.xlu0 %v1293_v60  ;;  %v1290_v61 = vpop.f32.mrb[18].mxu1  ;;  %v1900_v59 = vld [vmem:[#allocation16] sm:$0xff]   ;;  %v1901_v60 = vld [vmem:[#allocation16 + $0x8] sm:$0xff]  }
 0x59e   : > { %v1744_v62 = vpop.f32.mrb[19].mxu1  ;;  %1752 = vmatpush3.bf16.msra.mxu1 %v1900_v59 }
 0x59f   : > { %1753 = vmatprep.subr.bf16.mxu1 %v2229_v46 }
 0x5a2   : > { %1754 = vmatpush3.bf16.msra.mxu1 %v1901_v60 }
 0x5a5   : > { %v938_v63 = vpop.xlane.xlu0 %937 }
 0x5a6   : > { %v939_v0 = vsub.f32 %v930_v42, %v938_v63 }
 0x5a8   : > { %v940_v1 = vmul.f32 1.442695, %v939_v0 }
 0x5aa   : > { %1910 = vpow2.f32 %v940_v1 }
 0x5b4   : > { %v1911_v2 = vpop.eup %1910 }
 0x5b5   : > { %v942_v3 = vsel %vm889_vm3, %v1911_v2, 0.0 }
 0x5b6   : > { %943 = vadd.xlane.f32.xlu0 %v942_v3 }
 0x61a   : > { %v1054_v4 = vpop.xlane.xlu1 %1053 }
 0x61b   : > { %v1055_v5 = vsub.f32 %v1046_v48, %v1054_v4 }
 0x61d   : > { %v1056_v6 = vmul.f32 1.442695, %v1055_v5  ;;  %v1640_v5 = vld [vmem:[%s2816_s15] ss:$0 sm:$0xff] }
 0x61f   : > { %1912 = vpow2.f32 %v1056_v6 }
 0x622   : > { %v1176_v7 = vpop.xlane.xlu0 %1175 }
 0x623   : > { %v1177_v8 = vsub.f32 %v1168_v53, %v1176_v7 }
 0x625   : > { %v1178_v9 = vmul.f32 1.442695, %v1177_v8 }
 0x627   : > { %1914 = vpow2.f32 %v1178_v9 }
 0x629   : > { %v1913_v10 = vpop.eup %1912 }
 0x62a   : > { %v1058_v11 = vsel %vm889_vm3, %v1913_v10, 0.0  ;;  %v1295_v15 = vpop.xlane.xlu0 %1294 }
 0x62b   : > { %1059 = vadd.xlane.f32.xlu1 %v1058_v11  ;;  %v1296_v17 = vsub.f32 %v1287_v58, %v1295_v15 }
 0x62d   : > { %v1297_v19 = vmul.f32 1.442695, %v1296_v17 }
 0x631   : > { %v1915_v12 = vpop.eup %1914 }
 0x632   : > { %v1180_v13 = vsel %vm889_vm3, %v1915_v12, 0.0 }
 0x633   : > { %1181 = vadd.xlane.f32.xlu0 %v1180_v13 }
 0x63c   : > { %1186 = vrot.lane.b32.xlu1 %v1631_v14, %s2233_s28 }
 0x643   : > { %v944_v16 = vpop.xlane.xlu0 %943 }
 0x644   : > { %1916 = vrcp.f32 %v944_v16 }
 0x645   : > { %1918 = vpow2.f32 %v1297_v19 }
 0x649   : > { %1067 = vrot.lane.b32.xlu0 %v1631_v14, %s2231_s14  ;;  %s1448_s14 = sshll.u32 %s548_s24, 4  ;;  %s2720_s14 = int_to_ptr.vmem [resolvable:$true] %s1448_s14 }
 0x64a   : > { %s2124_s10 = scalar_lea.vmem %s2720_s14, 64  ;;  %p2131_p10 = scmp.lt.s32.totalorder %s2720_s14, %s2129_s22 }
 0x64b   : > { %p2125_p11 = scmp.ne.s32.totalorder %s2720_s14, %s2124_s10  ;;  %p2132_p13 = scmp.lt.s32.totalorder %s2130_s17, %s2124_s10 }
 0x64d   : > { %p2126_p5 = pnand %p2125_p11, %p2818_p0  ;;  %p2133_p2 = por %p2132_p13, %p2131_p10 }
 0x64e   : > { %v1917_v18 = vpop.eup %1916 }
 0x64f   : > { %v946_v20 = vmul.f32 %v1917_v18, %v1911_v2  ;;  %v1919_v22 = vpop.eup %1918  ;;  %p2127_p7 = pneg %p2126_p5 }
 0x650   : > { %v1299_v23 = vsel %vm889_vm3, %v1919_v22, 0.0 }
 0x651   : > { %v947_v21 = vpack.c.bf16 %v946_v20, %v946_v20  ;;  %p2134_p8 = pnand %p2133_p2, %p2127_p7 }
 0x653   : > { %1712 = vmatmul.mubr.msk.bf16.vlgmr.msra.gmra.mrb[8].mxu0 %vm889_vm3, %v947_v21 }
 0x654   : > { %1723 = vmatprep.mubr.msk.bf16.mxu0 %vm2230_vm1, %v2229_v46 }
 0x660   : > { %1300 = vadd.xlane.f32.xlu1 %v1299_v23 }
 0x671   : > { %1305 = vrot.lane.b32.xlu1 %v1631_v14, %s2232_s21 }
 0x6b8   : > { %v1060_v24 = vpop.xlane.xlu1 %1059 }
 0x6b9   : > { %1920 = vrcp.f32 %v1060_v24 }
 0x6bc   : > { %v1187_v30 = vpop.permute.xlu1 %1186 }
 0x6bd   : > { %v1192_v33 = vsel %vm951_vm4, %v1187_v30, 0 }
 0x6c0   : > { %v1182_v25 = vpop.xlane.xlu0 %1181 }
 0x6c1   : > { %1922 = vrcp.f32 %v1182_v25 }
 0x6c3   : > { %v1921_v26 = vpop.eup %1920 }
 0x6c4   : > { %v1062_v27 = vmul.f32 %v1921_v26, %v1913_v10  ;;  %v1068_v28 = vpop.permute.xlu0 %1067 }
 0x6c5   : > { %v1073_v29 = vsel %vm951_vm4, %v1068_v28, 0 }
 0x6c6   : > { %1722 = vmatpush3.bf16.msra.mxu0 %v1073_v29  ;;  %v1063_v31 = vpack.c.bf16 %v1062_v27, %v1062_v27 }
 0x6c7   : > { %1733 = vmatprep.subr.bf16.mxu0 %v2229_v46 }
 0x6c9   : > { %1724 = vmatmul.mubr.msk.bf16.vlgmr.msra.gmra.mrb[12].mxu0 %vm889_vm3, %v1063_v31 }
 0x6ca   : > { %1734 = vmatpush3.bf16.msra.mxu0 %v1192_v33  ;;  %1735 = vmatprep.mubr.msk.bf16.mxu0 %vm2230_vm1, %v2229_v46 }
 0x6cb   : > { %v1923_v34 = vpop.eup %1922  ;;  %1745 = vmatprep.subr.bf16.mxu0 %v2229_v46 }
 0x6cc   : > { %v1184_v35 = vmul.f32 %v1923_v34, %v1915_v12 }
 0x6ce   : > { %v1185_v36 = vpack.c.bf16 %v1184_v35, %v1184_v35 }
 0x6d1   : > { %1736 = vmatmul.mubr.msk.bf16.vlgmr.msra.gmra.mrb[16].mxu0 %vm889_vm3, %v1185_v36 }
 0x6d2   : > { %1747 = vmatprep.mubr.msk.bf16.mxu0 %vm2230_vm1, %v2229_v46 }
 0x6ed   : > { %v1301_v37 = vpop.xlane.xlu1 %1300 }
 0x6ee   : > { %1924 = vrcp.f32 %v1301_v37 }
 0x6f1   : > { %v1306_v38 = vpop.permute.xlu1 %1305 }
 0x6f2   : > { %v1311_v39 = vsel %vm951_vm4, %v1306_v38, 0 }
 0x6f3   : > { %1746 = vmatpush3.bf16.msra.mxu0 %v1311_v39 }
 0x6f8   : > { %v1925_v40 = vpop.eup %1924 }
 0x6f9   : > { %v1303_v41 = vmul.f32 %v1925_v40, %v1919_v22 }
 0x6fb   : > { %v1304_v42 = vpack.c.bf16 %v1303_v41, %v1303_v41 }
 0x6fd   : > { %1748 = vmatmul.mubr.msk.bf16.vlgmr.msra.gmra.mrb[20].mxu0 %vm889_vm3, %v1304_v42 }
 0x726   : > { %v989_v43 = vpop.f32.mrb[8].mxu0 }
 0x727   : > { %v995_v44 = vpack.c.bf16 %v989_v43, %v989_v43  ;;  %v1713_v45 = vpop.f32.mrb[9].mxu0 }
 0x728   : > { %v992_v47 = vpop.f32.mrb[10].mxu0 }
 0x729   : > { %997 = vst.msk [vmem:[#allocation4] sm:$0xf] %vm996_vm5, %v995_v44  ;;  %v1714_v48 = vpop.f32.mrb[11].mxu0 }
 0x79c   : > { %v1109_v49 = vpop.f32.mrb[12].mxu0 }
 0x79d   : > { %v1648_v50 = vpack.c.bf16 %v1109_v49, %v1109_v49  ;;  %v1725_v51 = vpop.f32.mrb[13].mxu0 }
 0x79e   : > { %v1112_v52 = vpop.f32.mrb[14].mxu0 }
 0x79f   : > { %1119 = vrot.lane.b32.xlu1 %v1648_v50, %s2234_s13  ;;  %v1726_v53 = vpop.f32.mrb[15].mxu0  ;;  %s2817_s13 = sld [smem:[#allocation30_spill]] }
 0x7a4   : > { %v1228_v54 = vpop.f32.mrb[16].mxu0 }
 0x7a5   : > { %v1649_v55 = vpack.c.bf16 %v1228_v54, %v1228_v54  ;;  %v1737_v56 = vpop.f32.mrb[17].mxu0 }
 0x7a6   : > { %v1231_v57 = vpop.f32.mrb[18].mxu0 }
 0x7a7   : > { %1238 = vrot.lane.b32.xlu0 %v1649_v55, %s2235_s5  ;;  %v1738_v58 = vpop.f32.mrb[19].mxu0  ;;  %s2718_s5 = scalar_lea.hbm %s2817_s13, %s1645_s16 }
 0x7d0   : > { %v1347_v61 = vpop.f32.mrb[20].mxu0 }
 0x7d1   : > { %v1650_v62 = vpack.c.bf16 %v1347_v61, %v1347_v61  ;;  %v1749_v63 = vpop.f32.mrb[21].mxu0 }
 0x7d2   : > { %v1350_v0 = vpop.f32.mrb[22].mxu0 }
 0x7d3   : > { %1357 = vrot.lane.b32.xlu1 %v1650_v62, %s2236_s4  ;;  %v1750_v1 = vpop.f32.mrb[23].mxu0  ;;  %s1434_s4 = scalar_lea.sflag [#allocation7], %s2569_s6 }
 0x811   : > { %v1120_v2 = vpop.permute.xlu1 %1119 }
 0x812   : > { %1123 = vst.msk [vmem:[#allocation4] sm:$0xf] %vm1122_vm6, %v1120_v2 }
 0x819   : > { %v1239_v3 = vpop.permute.xlu0 %1238 }
 0x81a   : > { %1242 = vst.msk [vmem:[#allocation4] sm:$0xf] %vm1241_vm7, %v1239_v3 }
 0x845   : > { %v1358_v4 = vpop.permute.xlu1 %1357 }
 0x846   : > { %1361 = vst.msk [vmem:[#allocation4] sm:$0xf] %vm1360_vm8, %v1358_v4 }
 0x84d   : > { %v1362_v46 = vld [vmem:[#allocation4] sm:$0xf] }
 0x84e   : > { %1756 = vmatmul.mubr.msk.bf16.vlgmr.msra.gmra.mrb[20].mxu1 %vm558_vm0, %v1362_v46 }
 0x921   : > { %v1423_v6 = vpop.f32.mrb[20].mxu1 }
 0x922   : > { %v1424_v7 = vadd.f32 %v1640_v5, %v1423_v6  ;;  %v1757_v8 = vpop.f32.mrb[21].mxu1 }
 0x923   : > { %v1426_v9 = vpop.f32.mrb[22].mxu1 }
 0x924   : > { %v1429_v10 = vadd.f32 %v1424_v7, %v2602_v32  ;;  %v1758_v11 = vpop.f32.mrb[23].mxu1 }
 0x926   : > { %v1430_v12 = vpack.c.bf16 %v1429_v10, %v1429_v10 }
 0x928   : > { %1432 = vst.msk [vmem:[%s548_s24] sm:$0xf] %vm747_vm2, %v1430_v12 }
 0x929   : > { %2137 = shalt.err (!%p2134_p8)
}
 0x92a   : > { %s2138_s6 = scalar_lea.hbm %s2718_s5, 64  ;;  %s2142_s24 = scalar_lea.hbm %s2817_s13, 128 }
 0x92b   : > { %p2139_p9 = scmp.ne.s32.totalorder %s2718_s5, %s2138_s6  ;;  %p2143_p3 = scmp.lt.u32.totalorder %s2718_s5, %s2817_s13 }
 0x92c   : > { %p2144_p1 = scmp.lt.u32.totalorder %s2142_s24, %s2138_s6  ;;  %p2146_p11 = scmp.lt.u32.totalorder %s2138_s6, %s2718_s5 }
 0x92d   : > { %p2140_p4 = pnand %p2139_p9, %p2818_p0 }
 0x92e   : > { %p2145_p12 = por %p2144_p1, %p2143_p3 }
 0x92f   : > { %p2141_p6 = pneg %p2140_p4 }
 0x930   : > { %p2147_p5 = por %p2146_p11, %p2145_p12 }
 0x932   : > { %p2148_p7 = pnand %p2147_p5, %p2141_p6 }
 0x934   : > { %2151 = shalt.err (!%p2148_p7)
}
 0x935   : > { %1785 = dma.vmem_to_hbm [thread:$0]  (%p2818_p0), %s2720_s14, 64, %s2718_s5, %s1434_s4  }
 0x936 PF: > { %s1460_s10 = sand.u32 1, %s2198_s25   ;;  %p2819_p10 = scmp.ne.s32.totalorder %s2809_s20, 0 }
 0x937   : > { %p2820_p13 = scmp.ge.s32.totalorder %s2218_s30, 2  ;;  %s1461_s3 = scalar_lea.sflag [#allocation7], %s1460_s10 }
 0x939   : > { %p1811_p2 = pnand %p2820_p13, %p2819_p10 }
 0x93b   : > { %2193 = dma.done.wait (!%p1811_p2), %s1461_s3, 64  }
 0x93c   : > { %2195 = vsyncadd (!%p1811_p2), %s1461_s3, 4294967232  ;;  %s32_s30 = sadd.s32 1, %s2218_s30   ;;  %s2821_s25 = smov %s2202_s26 }
 0x93d   : > { %p29_p8 = scmp.ge.s32.totalorder %s32_s30, 4   ;;  %s2822_s26 = smov %s2206_s27 }
 0x93e   : > { %s2823_s27 = smov %s2519_s18  ;;  %s2824_s28 = smov %s2214_s29 }
 0x93f   : > { %s2825_s29 = smov %s2827_s19  ;;  %31 = sbr.rel (!%p29_p8) target bundleno = 17 (0x11), region = 146 }
 0x946   :  { %1466 = vsyncpa [#allocation6], 1 }
 0x947   :  { %1468 = vsyncpa [#allocation6 + $0x1], 1 }
 0x948   :  { %1469 = vsyncpa [#allocation9], 1 }
 0x949   :  { %1470 = vsyncpa [#allocation12], 1 }
 0x94a   :  { %1471 = vsyncpa [#allocation15], 1 }
 0x94b   :  { %1472 = vsyncpa [#allocation7], 1 }
 0x94c   :  { %1474 = vsyncpa [#allocation7 + $0x1], 1 }

</bundles_post_ra>
